<compile_context>
chip_gen: v7x
topology: tpu7x:2x2x1
jax: 0.10.0
libtpu: 0.0.40
codegen_flags: <defaults>
</compile_context>

<pallas_src>
import functools

import jax
import jax.numpy as jnp
from jax.experimental import pallas as pl
from jax.experimental.pallas import tpu as pltpu


def _round_up(x, m):
    return (x + m - 1) // m * m


# -----------------------------------------------------------------------------
# Kernel: one (batch b, H-tile t) step.
#   conv(3x3) as 9 shifted matmuls -> bias+ReLU -> partial GAP accumulate;
#   mean + linear head in a last-tile finalize.
# -----------------------------------------------------------------------------
def _conv_gap_head_kernel(HW, x_ref, wc_ref, bc_ref, wh_ref, bh_ref,
                          y_ref, f_ref, acc_ref):
    # x_ref  : (tile_h+2, W+2, C) bf16  halo-padded NHWC activation tile
    # wc_ref : (9, C, Fp)         bf16  3x3 conv weight, tap-major (resident)
    # bc_ref : (1, Fp)            f32   conv bias (padded lanes zero)
    # wh_ref : (Fp, NCp)          bf16  head weight (resident)
    # bh_ref : (1, NCp)           f32   head bias
    # y_ref  : (1, NCp)           f32   logits for batch b   (written last tile)
    # f_ref  : (1, Fp)            f32   pooled features      (written last tile)
    # acc_ref: (1, Fp)            f32   running spatial sum of ReLU(conv)
    t = pl.program_id(1)
    n_t = pl.num_programs(1)

    @pl.when(t == 0)
    def _():
        acc_ref[...] = jnp.zeros_like(acc_ref)

    TH = x_ref.shape[0] - 2
    W = x_ref.shape[1] - 2
    C = x_ref.shape[2]
    Fp = wc_ref.shape[2]

    # 3x3 conv as 9 shifted (TH*W, C) x (C, Fp) MXU matmuls, f32 accumulate.
    conv = jnp.zeros((TH * W, Fp), dtype=jnp.float32)
    for di in range(3):
        for dj in range(3):
            xs = x_ref[di:di + TH, dj:dj + W, :].reshape(TH * W, C)
            conv = conv + jnp.dot(xs, wc_ref[di * 3 + dj],
                                  preferred_element_type=jnp.float32)

    h = jnp.maximum(conv + bc_ref[...], 0.0)            # bias + ReLU (f32 VPU)

    # Partial global-average-pool: accumulate the spatial sum in f32 scratch.
    acc_ref[...] += jnp.sum(h, axis=0, keepdims=True)   # (1, Fp)

    # Finalize once per batch row: mean + linear head (tiny M=1 matmul).
    @pl.when(t == n_t - 1)
    def _():
        feats = acc_ref[...] * (1.0 / float(HW))
        f_ref[...] = feats
        y_ref[...] = (jnp.dot(feats.astype(wh_ref.dtype), wh_ref[...],
                              preferred_element_type=jnp.float32)
                      + bh_ref[...])


# -----------------------------------------------------------------------------
# Wrapper mirroring TimmClassifier.forward.
# -----------------------------------------------------------------------------
def timm_classifier_forward(x, w_conv, b_conv, w_head, b_head, *, tile_h=8):
    """x: (B, C, H, W) f32; w_conv: (3, 3, C, F); returns (y, features) f32."""
    B, C, H, W = x.shape
    KH, KW, _, F = w_conv.shape
    NC = w_head.shape[1]
    assert KH == 3 and KW == 3
    assert H % tile_h == 0
    n_tiles = H // tile_h
    HW = H * W

    # Lane-dense padding only on output dims; contraction dim C is NOT padded.
    Fp = _round_up(F, 128)
    NCp = _round_up(NC, 128)

    # NCHW -> NHWC, zero-pad spatially by 1, split H into overlapping halo tiles.
    x_nhwc = jnp.transpose(x, (0, 2, 3, 1))
    xp = jnp.pad(x_nhwc, ((0, 0), (1, 1), (1, 1), (0, 0)))
    x_tiles = jnp.stack(
        [xp[:, t * tile_h:t * tile_h + tile_h + 2, :, :] for t in range(n_tiles)],
        axis=1).astype(jnp.bfloat16)              # (B, n_tiles, tile_h+2, W+2, C)

    wc = jnp.pad(w_conv.reshape(9, C, F),
                 ((0, 0), (0, 0), (0, Fp - F))).astype(jnp.bfloat16)
    bc = jnp.pad(b_conv, (0, Fp - F)).reshape(1, Fp).astype(jnp.float32)
    wh = jnp.pad(w_head, ((0, Fp - F), (0, NCp - NC))).astype(jnp.bfloat16)
    bh = jnp.pad(b_head, (0, NCp - NC)).reshape(1, NCp).astype(jnp.float32)

    flops = 2 * B * HW * 9 * C * Fp + 2 * B * Fp * NCp
    bytes_accessed = (x_tiles.size * 2 + wc.size * 2 + wh.size * 2
                      + bc.size * 4 + bh.size * 4 + B * (NCp + Fp) * 4)

    kernel = functools.partial(_conv_gap_head_kernel, HW)

    y_pad, f_pad = pl.pallas_call(
        kernel,
        grid=(B, n_tiles),
        in_specs=[
            # Streamed activation tile (double-buffered by the pipeline).
            pl.BlockSpec((None, None, tile_h + 2, W + 2, C),
                         lambda b, t: (b, t, 0, 0, 0)),
            # Resident weights / biases: constant block index -> fetched once.
            pl.BlockSpec((9, C, Fp), lambda b, t: (0, 0, 0)),
            pl.BlockSpec((1, Fp), lambda b, t: (0, 0)),
            pl.BlockSpec((Fp, NCp), lambda b, t: (0, 0)),
            pl.BlockSpec((1, NCp), lambda b, t: (0, 0)),
        ],
        out_specs=(
            pl.BlockSpec((None, 1, NCp), lambda b, t: (b, 0, 0)),
            pl.BlockSpec((None, 1, Fp), lambda b, t: (b, 0, 0)),
        ),
        out_shape=(
            jax.ShapeDtypeStruct((B, 1, NCp), jnp.float32),
            jax.ShapeDtypeStruct((B, 1, Fp), jnp.float32),
        ),
        scratch_shapes=[pltpu.VMEM((1, Fp), jnp.float32)],
        compiler_params=pltpu.CompilerParams(
            dimension_semantics=("parallel", "arbitrary"),
            vmem_limit_bytes=32 * 1024 * 1024),
        cost_estimate=pl.CostEstimate(flops=flops, transcendentals=0,
                                      bytes_accessed=bytes_accessed),
    )(x_tiles, wc, bc, wh, bh)

    # Slice the lane padding back off.
    return y_pad[:, 0, :NC], f_pad[:, 0, :F]


# -----------------------------------------------------------------------------
# Pure-JAX reference for a correctness sanity check.
# -----------------------------------------------------------------------------
def _reference(x, w_conv, b_conv, w_head, b_head):
    x_nhwc = jnp.transpose(x, (0, 2, 3, 1))
    h = jax.lax.conv_general_dilated(
        x_nhwc, w_conv, window_strides=(1, 1), padding="SAME",
        dimension_numbers=("NHWC", "HWIO", "NHWC"))
    h = jnp.maximum(h + b_conv, 0.0)
    feats = jnp.mean(h, axis=(1, 2))
    y = feats @ w_head + b_head
    return y, feats


if __name__ == "__main__":
    # Small shapes consistent with the module's forward (in_chans = 4).
    B, C, H, W = 2, 4, 16, 16
    NUM_FEATURES = 32              # backbone.num_features (synthetic)
    CLASS_NUM = 10

    key = jax.random.PRNGKey(0)
    kx, kwc, kbc, kwh, kbh = jax.random.split(key, 5)

    x = jax.random.normal(kx, (B, C, H, W), dtype=jnp.float32)
    w_conv = 0.1 * jax.random.normal(kwc, (3, 3, C, NUM_FEATURES),
                                     dtype=jnp.float32)
    b_conv = 0.01 * jax.random.normal(kbc, (NUM_FEATURES,), dtype=jnp.float32)
    w_head = 0.1 * jax.random.normal(kwh, (NUM_FEATURES, CLASS_NUM),
                                     dtype=jnp.float32)
    b_head = 0.01 * jax.random.normal(kbh, (CLASS_NUM,), dtype=jnp.float32)

    fwd = jax.jit(timm_classifier_forward)
    y, features = fwd(x, w_conv, b_conv, w_head, b_head)
    jax.block_until_ready((y, features))

    assert y.shape == (B, CLASS_NUM) and features.shape == (B, NUM_FEATURES)

    # Loose tolerance: kernel uses bf16 operands with f32 accumulation.
    y_ref, f_ref = _reference(x, w_conv, b_conv, w_head, b_head)
    assert float(jnp.max(jnp.abs(features - f_ref))) < 5e-2
    assert float(jnp.max(jnp.abs(y - y_ref))) < 5e-2

    print("KERNEL_OK")
</pallas_src>

<mosaic_0001>
module attributes {stable_mosaic.version = 11 : i64} {
  func.func @_conv_gap_head_kernel(%arg0: i32, %arg1: i32, %arg2: memref<1x1x10x18x4xbf16, #tpu.memory_space<vmem>>, %arg3: memref<9x4x128xbf16, #tpu.memory_space<vmem>>, %arg4: memref<1x128xf32, #tpu.memory_space<vmem>>, %arg5: memref<128x128xbf16, #tpu.memory_space<vmem>>, %arg6: memref<1x128xf32, #tpu.memory_space<vmem>>, %arg7: memref<1x1x128xf32, #tpu.memory_space<vmem>>, %arg8: memref<1x1x128xf32, #tpu.memory_space<vmem>>, %arg9: memref<1x128xf32, #tpu.memory_space<vmem>>) attributes {dimension_semantics = [#tpu.dimension_semantics<parallel>, #tpu.dimension_semantics<arbitrary>], iteration_bounds = array<i64: 2, 2>, scalar_prefetch = 0 : i64, scratch_operands = 1 : i64, tpu.core_type = #tpu.core_type<tc>, window_params = [{transform_indices = @transform_0, window_bounds = array<i64: 1, 1, 10, 18, 4>}, {pipeline_mode = #tpu.pipeline_mode<synchronous>, transform_indices = @transform_1, window_bounds = array<i64: 9, 4, 128>}, {pipeline_mode = #tpu.pipeline_mode<synchronous>, transform_indices = @transform_2, window_bounds = array<i64: 1, 128>}, {pipeline_mode = #tpu.pipeline_mode<synchronous>, transform_indices = @transform_3, window_bounds = array<i64: 128, 128>}, {pipeline_mode = #tpu.pipeline_mode<synchronous>, transform_indices = @transform_4, window_bounds = array<i64: 1, 128>}, {transform_indices = @transform_5, window_bounds = array<i64: 1, 1, 128>}, {transform_indices = @transform_6, window_bounds = array<i64: 1, 1, 128>}]} {
    %c0_i32 = arith.constant 0 : i32
    %0 = arith.cmpi eq, %arg1, %c0_i32 : i32
    %1 = arith.extui %0 : i1 to i32
    %c0_i32_0 = arith.constant 0 : i32
    %2 = arith.cmpi ne, %1, %c0_i32_0 : i32
    scf.if %2 {
      %cst_82 = arith.constant 0.000000e+00 : f32
      %80 = vector.broadcast %cst_82 : f32 to vector<1x128xf32>
      %c0_83 = arith.constant 0 : index
      %c0_84 = arith.constant 0 : index
      %81 = vector.load %arg9[%c0_83, %c0_84] : memref<1x128xf32, #tpu.memory_space<vmem>>, vector<1x128xf32>
      tpu.vector_store %arg9[%c0_83, %c0_84], %80 {strides = array<i32>} : memref<1x128xf32, #tpu.memory_space<vmem>>, vector<1x128xf32>,
    } else {
    }
    %cst = arith.constant 0.000000e+00 : f32
    %3 = vector.broadcast %cst : f32 to vector<128x128xf32>
    %c0 = arith.constant 0 : index
    %c0_1 = arith.constant 0 : index
    %c0_2 = arith.constant 0 : index
    %c0_3 = arith.constant 0 : index
    %c0_4 = arith.constant 0 : index
    %4 = vector.load %arg2[%c0, %c0_1, %c0_2, %c0_3, %c0_4] : memref<1x1x10x18x4xbf16, #tpu.memory_space<vmem>>, vector<1x1x8x16x4xbf16>
    %5 = vector.shape_cast %4 : vector<1x1x8x16x4xbf16> to vector<8x16x4xbf16>
    %6 = vector.shape_cast %5 : vector<8x16x4xbf16> to vector<128x4xbf16>
    %c0_5 = arith.constant 0 : index
    %c0_6 = arith.constant 0 : index
    %c0_7 = arith.constant 0 : index
    %7 = vector.load %arg3[%c0_5, %c0_6, %c0_7] : memref<9x4x128xbf16, #tpu.memory_space<vmem>>, vector<1x4x128xbf16>
    %8 = vector.shape_cast %7 : vector<1x4x128xbf16> to vector<4x128xbf16>
    %cst_8 = arith.constant dense<0.000000e+00> : vector<128x128xf32>
    %9 = tpu.matmul %6, %8, %cst_8 {dimension_numbers = #tpu.dot_dimension_numbers<[1], [0], [0], [1], [0, 0, 1, 1], [], []>} : vector<128x4xbf16>, vector<4x128xbf16>, vector<128x128xf32> -> vector<128x128xf32>
    %10 = arith.addf %3, %9 : vector<128x128xf32>
    %c0_9 = arith.constant 0 : index
    %c0_10 = arith.constant 0 : index
    %c0_11 = arith.constant 0 : index
    %c1 = arith.constant 1 : index
    %c0_12 = arith.constant 0 : index
    %11 = vector.load %arg2[%c0_9, %c0_10, %c0_11, %c1, %c0_12] : memref<1x1x10x18x4xbf16, #tpu.memory_space<vmem>>, vector<1x1x8x16x4xbf16>
    %12 = vector.shape_cast %11 : vector<1x1x8x16x4xbf16> to vector<8x16x4xbf16>
    %13 = vector.shape_cast %12 : vector<8x16x4xbf16> to vector<128x4xbf16>
    %c1_13 = arith.constant 1 : index
    %c0_14 = arith.constant 0 : index
    %c0_15 = arith.constant 0 : index
    %14 = vector.load %arg3[%c1_13, %c0_14, %c0_15] : memref<9x4x128xbf16, #tpu.memory_space<vmem>>, vector<1x4x128xbf16>
    %15 = vector.shape_cast %14 : vector<1x4x128xbf16> to vector<4x128xbf16>
    %cst_16 = arith.constant dense<0.000000e+00> : vector<128x128xf32>
    %16 = tpu.matmul %13, %15, %cst_16 {dimension_numbers = #tpu.dot_dimension_numbers<[1], [0], [0], [1], [0, 0, 1, 1], [], []>} : vector<128x4xbf16>, vector<4x128xbf16>, vector<128x128xf32> -> vector<128x128xf32>
    %17 = arith.addf %10, %16 : vector<128x128xf32>
    %c0_17 = arith.constant 0 : index
    %c0_18 = arith.constant 0 : index
    %c0_19 = arith.constant 0 : index
    %c2 = arith.constant 2 : index
    %c0_20 = arith.constant 0 : index
    %18 = vector.load %arg2[%c0_17, %c0_18, %c0_19, %c2, %c0_20] : memref<1x1x10x18x4xbf16, #tpu.memory_space<vmem>>, vector<1x1x8x16x4xbf16>
    %19 = vector.shape_cast %18 : vector<1x1x8x16x4xbf16> to vector<8x16x4xbf16>
    %20 = vector.shape_cast %19 : vector<8x16x4xbf16> to vector<128x4xbf16>
    %c2_21 = arith.constant 2 : index
    %c0_22 = arith.constant 0 : index
    %c0_23 = arith.constant 0 : index
    %21 = vector.load %arg3[%c2_21, %c0_22, %c0_23] : memref<9x4x128xbf16, #tpu.memory_space<vmem>>, vector<1x4x128xbf16>
    %22 = vector.shape_cast %21 : vector<1x4x128xbf16> to vector<4x128xbf16>
    %cst_24 = arith.constant dense<0.000000e+00> : vector<128x128xf32>
    %23 = tpu.matmul %20, %22, %cst_24 {dimension_numbers = #tpu.dot_dimension_numbers<[1], [0], [0], [1], [0, 0, 1, 1], [], []>} : vector<128x4xbf16>, vector<4x128xbf16>, vector<128x128xf32> -> vector<128x128xf32>
    %24 = arith.addf %17, %23 : vector<128x128xf32>
    %c0_25 = arith.constant 0 : index
    %c0_26 = arith.constant 0 : index
    %c1_27 = arith.constant 1 : index
    %c0_28 = arith.constant 0 : index
    %c0_29 = arith.constant 0 : index
    %25 = vector.load %arg2[%c0_25, %c0_26, %c1_27, %c0_28, %c0_29] : memref<1x1x10x18x4xbf16, #tpu.memory_space<vmem>>, vector<1x1x8x16x4xbf16>
    %26 = vector.shape_cast %25 : vector<1x1x8x16x4xbf16> to vector<8x16x4xbf16>
    %27 = vector.shape_cast %26 : vector<8x16x4xbf16> to vector<128x4xbf16>
    %c3 = arith.constant 3 : index
    %c0_30 = arith.constant 0 : index
    %c0_31 = arith.constant 0 : index
    %28 = vector.load %arg3[%c3, %c0_30, %c0_31] : memref<9x4x128xbf16, #tpu.memory_space<vmem>>, vector<1x4x128xbf16>
    %29 = vector.shape_cast %28 : vector<1x4x128xbf16> to vector<4x128xbf16>
    %cst_32 = arith.constant dense<0.000000e+00> : vector<128x128xf32>
    %30 = tpu.matmul %27, %29, %cst_32 {dimension_numbers = #tpu.dot_dimension_numbers<[1], [0], [0], [1], [0, 0, 1, 1], [], []>} : vector<128x4xbf16>, vector<4x128xbf16>, vector<128x128xf32> -> vector<128x128xf32>
    %31 = arith.addf %24, %30 : vector<128x128xf32>
    %c0_33 = arith.constant 0 : index
    %c0_34 = arith.constant 0 : index
    %c1_35 = arith.constant 1 : index
    %c1_36 = arith.constant 1 : index
    %c0_37 = arith.constant 0 : index
    %32 = vector.load %arg2[%c0_33, %c0_34, %c1_35, %c1_36, %c0_37] : memref<1x1x10x18x4xbf16, #tpu.memory_space<vmem>>, vector<1x1x8x16x4xbf16>
    %33 = vector.shape_cast %32 : vector<1x1x8x16x4xbf16> to vector<8x16x4xbf16>
    %34 = vector.shape_cast %33 : vector<8x16x4xbf16> to vector<128x4xbf16>
    %c4 = arith.constant 4 : index
    %c0_38 = arith.constant 0 : index
    %c0_39 = arith.constant 0 : index
    %35 = vector.load %arg3[%c4, %c0_38, %c0_39] : memref<9x4x128xbf16, #tpu.memory_space<vmem>>, vector<1x4x128xbf16>
    %36 = vector.shape_cast %35 : vector<1x4x128xbf16> to vector<4x128xbf16>
    %cst_40 = arith.constant dense<0.000000e+00> : vector<128x128xf32>
    %37 = tpu.matmul %34, %36, %cst_40 {dimension_numbers = #tpu.dot_dimension_numbers<[1], [0], [0], [1], [0, 0, 1, 1], [], []>} : vector<128x4xbf16>, vector<4x128xbf16>, vector<128x128xf32> -> vector<128x128xf32>
    %38 = arith.addf %31, %37 : vector<128x128xf32>
    %c0_41 = arith.constant 0 : index
    %c0_42 = arith.constant 0 : index
    %c1_43 = arith.constant 1 : index
    %c2_44 = arith.constant 2 : index
    %c0_45 = arith.constant 0 : index
    %39 = vector.load %arg2[%c0_41, %c0_42, %c1_43, %c2_44, %c0_45] : memref<1x1x10x18x4xbf16, #tpu.memory_space<vmem>>, vector<1x1x8x16x4xbf16>
    %40 = vector.shape_cast %39 : vector<1x1x8x16x4xbf16> to vector<8x16x4xbf16>
    %41 = vector.shape_cast %40 : vector<8x16x4xbf16> to vector<128x4xbf16>
    %c5 = arith.constant 5 : index
    %c0_46 = arith.constant 0 : index
    %c0_47 = arith.constant 0 : index
    %42 = vector.load %arg3[%c5, %c0_46, %c0_47] : memref<9x4x128xbf16, #tpu.memory_space<vmem>>, vector<1x4x128xbf16>
    %43 = vector.shape_cast %42 : vector<1x4x128xbf16> to vector<4x128xbf16>
    %cst_48 = arith.constant dense<0.000000e+00> : vector<128x128xf32>
    %44 = tpu.matmul %41, %43, %cst_48 {dimension_numbers = #tpu.dot_dimension_numbers<[1], [0], [0], [1], [0, 0, 1, 1], [], []>} : vector<128x4xbf16>, vector<4x128xbf16>, vector<128x128xf32> -> vector<128x128xf32>
    %45 = arith.addf %38, %44 : vector<128x128xf32>
    %c0_49 = arith.constant 0 : index
    %c0_50 = arith.constant 0 : index
    %c2_51 = arith.constant 2 : index
    %c0_52 = arith.constant 0 : index
    %c0_53 = arith.constant 0 : index
    %46 = vector.load %arg2[%c0_49, %c0_50, %c2_51, %c0_52, %c0_53] : memref<1x1x10x18x4xbf16, #tpu.memory_space<vmem>>, vector<1x1x8x16x4xbf16>
    %47 = vector.shape_cast %46 : vector<1x1x8x16x4xbf16> to vector<8x16x4xbf16>
    %48 = vector.shape_cast %47 : vector<8x16x4xbf16> to vector<128x4xbf16>
    %c6 = arith.constant 6 : index
    %c0_54 = arith.constant 0 : index
    %c0_55 = arith.constant 0 : index
    %49 = vector.load %arg3[%c6, %c0_54, %c0_55] : memref<9x4x128xbf16, #tpu.memory_space<vmem>>, vector<1x4x128xbf16>
    %50 = vector.shape_cast %49 : vector<1x4x128xbf16> to vector<4x128xbf16>
    %cst_56 = arith.constant dense<0.000000e+00> : vector<128x128xf32>
    %51 = tpu.matmul %48, %50, %cst_56 {dimension_numbers = #tpu.dot_dimension_numbers<[1], [0], [0], [1], [0, 0, 1, 1], [], []>} : vector<128x4xbf16>, vector<4x128xbf16>, vector<128x128xf32> -> vector<128x128xf32>
    %52 = arith.addf %45, %51 : vector<128x128xf32>
    %c0_57 = arith.constant 0 : index
    %c0_58 = arith.constant 0 : index
    %c2_59 = arith.constant 2 : index
    %c1_60 = arith.constant 1 : index
    %c0_61 = arith.constant 0 : index
    %53 = vector.load %arg2[%c0_57, %c0_58, %c2_59, %c1_60, %c0_61] : memref<1x1x10x18x4xbf16, #tpu.memory_space<vmem>>, vector<1x1x8x16x4xbf16>
    %54 = vector.shape_cast %53 : vector<1x1x8x16x4xbf16> to vector<8x16x4xbf16>
    %55 = vector.shape_cast %54 : vector<8x16x4xbf16> to vector<128x4xbf16>
    %c7 = arith.constant 7 : index
    %c0_62 = arith.constant 0 : index
    %c0_63 = arith.constant 0 : index
    %56 = vector.load %arg3[%c7, %c0_62, %c0_63] : memref<9x4x128xbf16, #tpu.memory_space<vmem>>, vector<1x4x128xbf16>
    %57 = vector.shape_cast %56 : vector<1x4x128xbf16> to vector<4x128xbf16>
    %cst_64 = arith.constant dense<0.000000e+00> : vector<128x128xf32>
    %58 = tpu.matmul %55, %57, %cst_64 {dimension_numbers = #tpu.dot_dimension_numbers<[1], [0], [0], [1], [0, 0, 1, 1], [], []>} : vector<128x4xbf16>, vector<4x128xbf16>, vector<128x128xf32> -> vector<128x128xf32>
    %59 = arith.addf %52, %58 : vector<128x128xf32>
    %c0_65 = arith.constant 0 : index
    %c0_66 = arith.constant 0 : index
    %c2_67 = arith.constant 2 : index
    %c2_68 = arith.constant 2 : index
    %c0_69 = arith.constant 0 : index
    %60 = vector.load %arg2[%c0_65, %c0_66, %c2_67, %c2_68, %c0_69] : memref<1x1x10x18x4xbf16, #tpu.memory_space<vmem>>, vector<1x1x8x16x4xbf16>
    %61 = vector.shape_cast %60 : vector<1x1x8x16x4xbf16> to vector<8x16x4xbf16>
    %62 = vector.shape_cast %61 : vector<8x16x4xbf16> to vector<128x4xbf16>
    %c8 = arith.constant 8 : index
    %c0_70 = arith.constant 0 : index
    %c0_71 = arith.constant 0 : index
    %63 = vector.load %arg3[%c8, %c0_70, %c0_71] : memref<9x4x128xbf16, #tpu.memory_space<vmem>>, vector<1x4x128xbf16>
    %64 = vector.shape_cast %63 : vector<1x4x128xbf16> to vector<4x128xbf16>
    %cst_72 = arith.constant dense<0.000000e+00> : vector<128x128xf32>
    %65 = tpu.matmul %62, %64, %cst_72 {dimension_numbers = #tpu.dot_dimension_numbers<[1], [0], [0], [1], [0, 0, 1, 1], [], []>} : vector<128x4xbf16>, vector<4x128xbf16>, vector<128x128xf32> -> vector<128x128xf32>
    %66 = arith.addf %59, %65 : vector<128x128xf32>
    %c0_73 = arith.constant 0 : index
    %c0_74 = arith.constant 0 : index
    %67 = vector.load %arg4[%c0_73, %c0_74] : memref<1x128xf32, #tpu.memory_space<vmem>>, vector<1x128xf32>
    %68 = vector.broadcast %67 : vector<1x128xf32> to vector<128x128xf32>
    %69 = arith.addf %66, %68 : vector<128x128xf32>
    %cst_75 = arith.constant 0.000000e+00 : f32
    %70 = vector.broadcast %cst_75 : f32 to vector<128x128xf32>
    %71 = arith.maximumf %69, %70 : vector<128x128xf32>
    %c0_76 = arith.constant 0 : index
    %c0_77 = arith.constant 0 : index
    %72 = vector.load %arg9[%c0_76, %c0_77] : memref<1x128xf32, #tpu.memory_space<vmem>>, vector<1x128xf32>
    %cst_78 = arith.constant dense<0.000000e+00> : vector<128xf32>
    %73 = vector.multi_reduction <add>, %71, %cst_78 [0] : vector<128x128xf32> to vector<128xf32>
    %74 = vector.shape_cast %73 : vector<128xf32> to vector<1x128xf32>
    %75 = arith.addf %72, %74 : vector<1x128xf32>
    %c0_79 = arith.constant 0 : index
    %c0_80 = arith.constant 0 : index
    %76 = vector.load %arg9[%c0_79, %c0_80] : memref<1x128xf32, #tpu.memory_space<vmem>>, vector<1x128xf32>
    tpu.vector_store %arg9[%c0_79, %c0_80], %75 {strides = array<i32>} : memref<1x128xf32, #tpu.memory_space<vmem>>, vector<1x128xf32>,
    %c1_i32 = arith.constant 1 : i32
    %77 = arith.cmpi eq, %arg1, %c1_i32 : i32
    %78 = arith.extui %77 : i1 to i32
    %c0_i32_81 = arith.constant 0 : i32
    %79 = arith.cmpi ne, %78, %c0_i32_81 : i32
    scf.if %79 {
      %c0_82 = arith.constant 0 : index
      %c0_83 = arith.constant 0 : index
      %80 = vector.load %arg9[%c0_82, %c0_83] : memref<1x128xf32, #tpu.memory_space<vmem>>, vector<1x128xf32>
      %cst_84 = arith.constant 3.906250e-03 : f32
      %81 = vector.broadcast %cst_84 : f32 to vector<1x128xf32>
      %82 = arith.mulf %80, %81 : vector<1x128xf32>
      %c0_85 = arith.constant 0 : index
      %c0_86 = arith.constant 0 : index
      %c0_87 = arith.constant 0 : index
      %83 = vector.load %arg8[%c0_85, %c0_86, %c0_87] : memref<1x1x128xf32, #tpu.memory_space<vmem>>, vector<1x1x128xf32>
      %84 = vector.shape_cast %83 : vector<1x1x128xf32> to vector<1x128xf32>
      %85 = vector.shape_cast %82 : vector<1x128xf32> to vector<1x1x128xf32>
      tpu.vector_store %arg8[%c0_85, %c0_86, %c0_87], %85 {strides = array<i32>} : memref<1x1x128xf32, #tpu.memory_space<vmem>>, vector<1x1x128xf32>,
      %86 = arith.truncf %82 : vector<1x128xf32> to vector<1x128xbf16>
      %c0_88 = arith.constant 0 : index
      %c0_89 = arith.constant 0 : index
      %87 = vector.load %arg5[%c0_88, %c0_89] : memref<128x128xbf16, #tpu.memory_space<vmem>>, vector<128x128xbf16>
      %cst_90 = arith.constant dense<0.000000e+00> : vector<1x128xf32>
      %88 = tpu.matmul %86, %87, %cst_90 {dimension_numbers = #tpu.dot_dimension_numbers<[1], [0], [0], [1], [0, 0, 1, 1], [], []>} : vector<1x128xbf16>, vector<128x128xbf16>, vector<1x128xf32> -> vector<1x128xf32>
      %c0_91 = arith.constant 0 : index
      %c0_92 = arith.constant 0 : index
      %89 = vector.load %arg6[%c0_91, %c0_92] : memref<1x128xf32, #tpu.memory_space<vmem>>, vector<1x128xf32>
      %90 = arith.addf %88, %89 : vector<1x128xf32>
      %c0_93 = arith.constant 0 : index
      %c0_94 = arith.constant 0 : index
      %c0_95 = arith.constant 0 : index
      %91 = vector.load %arg7[%c0_93, %c0_94, %c0_95] : memref<1x1x128xf32, #tpu.memory_space<vmem>>, vector<1x1x128xf32>
      %92 = vector.shape_cast %91 : vector<1x1x128xf32> to vector<1x128xf32>
      %93 = vector.shape_cast %90 : vector<1x128xf32> to vector<1x1x128xf32>
      tpu.vector_store %arg7[%c0_93, %c0_94, %c0_95], %93 {strides = array<i32>} : memref<1x1x128xf32, #tpu.memory_space<vmem>>, vector<1x1x128xf32>,
    } else {
    }
    return
  }
  func.func @transform_0(%arg0: i32, %arg1: i32) -> (i32, i32, i32, i32, i32) {
    %c0_i32 = arith.constant 0 : i32
    %c0_i32_0 = arith.constant 0 : i32
    %c0_i32_1 = arith.constant 0 : i32
    %c0_i32_2 = arith.constant 0 : i32
    return %arg0, %arg1, %c0_i32, %c0_i32_0, %c0_i32_1 : i32, i32, i32, i32, i32
  }
  func.func @transform_1(%arg0: i32, %arg1: i32) -> (i32, i32, i32) {
    %c0_i32 = arith.constant 0 : i32
    %c0_i32_0 = arith.constant 0 : i32
    %c0_i32_1 = arith.constant 0 : i32
    %c0_i32_2 = arith.constant 0 : i32
    return %c0_i32, %c0_i32_0, %c0_i32_1 : i32, i32, i32
  }
  func.func @transform_2(%arg0: i32, %arg1: i32) -> (i32, i32) {
    %c0_i32 = arith.constant 0 : i32
    %c0_i32_0 = arith.constant 0 : i32
    %c0_i32_1 = arith.constant 0 : i32
    return %c0_i32, %c0_i32_0 : i32, i32
  }
  func.func @transform_3(%arg0: i32, %arg1: i32) -> (i32, i32) {
    %c0_i32 = arith.constant 0 : i32
    %c0_i32_0 = arith.constant 0 : i32
    %c0_i32_1 = arith.constant 0 : i32
    return %c0_i32, %c0_i32_0 : i32, i32
  }
  func.func @transform_4(%arg0: i32, %arg1: i32) -> (i32, i32) {
    %c0_i32 = arith.constant 0 : i32
    %c0_i32_0 = arith.constant 0 : i32
    %c0_i32_1 = arith.constant 0 : i32
    return %c0_i32, %c0_i32_0 : i32, i32
  }
  func.func @transform_5(%arg0: i32, %arg1: i32) -> (i32, i32, i32) {
    %c0_i32 = arith.constant 0 : i32
    %c0_i32_0 = arith.constant 0 : i32
    %c0_i32_1 = arith.constant 0 : i32
    return %arg0, %c0_i32, %c0_i32_0 : i32, i32, i32
  }
  func.func @transform_6(%arg0: i32, %arg1: i32) -> (i32, i32, i32) {
    %c0_i32 = arith.constant 0 : i32
    %c0_i32_0 = arith.constant 0 : i32
    %c0_i32_1 = arith.constant 0 : i32
    return %arg0, %c0_i32, %c0_i32_0 : i32, i32, i32
  }
}

</mosaic_0001>

<bundles_post_ra>
// kernel: timm_classifier_forward.1
= control target key start
LH: loop header
LB: loop body
LE: loop exit
PB: predicated region body
PF: predicated region fallthrough
CT: control target
= control target key end

     0   :  { %12 = vsyncpa [#allocation4], 0  ;;  %s5114_s0 = inlined_call_operand.vmem [shape: bf16[2,2,10,18,4], index: 0, kind: input, shape index: {}]   ;;  %s5115_s1 = inlined_call_operand.vmem [shape: bf16[9,4,128], index: 1, kind: input, shape index: {}]   ;;  %s5116_s2 = inlined_call_operand.vmem [shape: f32[1,128], index: 2, kind: input, shape index: {}]   ;;  %s5117_s3 = inlined_call_operand.vmem [shape: bf16[128,128], index: 3, kind: input, shape index: {}]   ;;  %s5118_s4 = inlined_call_operand.vmem [shape: f32[1,128], index: 4, kind: input, shape index: {}]   ;;  %s5119_s5 = inlined_call_operand.hbm [shape: f32[2,1,128], index: 5, kind: output, shape index: {0}]   ;;  %s5120_s6 = inlined_call_operand.hbm [shape: f32[2,1,128], index: 6, kind: output, shape index: {1}]  }
   0x1   :  { %14 = vsyncpa [#allocation4 + $0x1], 0 }
   0x2   :  { %15 = vsyncpa [#allocation6], 0 }
   0x3   :  { %17 = vsyncpa [#allocation6 + $0x1], 0  ;;  %s4043_s21 = smov 0   ;;  %s4045_s22 = smov 0  }
   0x4   :  { %s4047_s23 = smov 0   ;;  %s4049_s24 = smov 0  }
   0x5   :  { %s4051_s25 = smov 0   ;;  %s4053_s26 = smov 0  }
   0x6   :  { %s4055_s27 = smov 0   ;;  %s4057_s28 = smov 0  }
   0x7 LB: > { %5127 = sst [smem:[#allocation9_spill]] %s3997_s27  ;;  %s3056_s29 = sadd.s32 4294967295, %s4001_s28   ;;  %s4001_s28 = sphi %s4057_s28, %s23_s28   ;;  %s3997_s27 = sphi %s4055_s27, %s5150_s27   ;;  %s3993_s26 = sphi %s4053_s26, %s5155_s26   ;;  %s3989_s25 = sphi %s4051_s25, %s5148_s25   ;;  %s3985_s24 = sphi %s4049_s24, %s5154_s24   ;;  %s3981_s23 = sphi %s4047_s23, %s5153_s23   ;;  %s3977_s22 = sphi %s4045_s22, %s5152_s22   ;;  %s3973_s21 = sphi %s4043_s21, %s5151_s21  }
   0x8   : > { %s3057_s30 = sadd.s32 4294967294, %s4001_s28   ;;  %s32_s7 = sadd.s32 1, %s3993_s26 }
   0x9   : > { %p33_p0 = scmp.ge.s32.totalorder %s32_s7, 2  ;;  %s35_s8 = sadd.s32 1, %s3997_s27 }
   0xa   : > { %p164_p1 = scmp.ne.s32.totalorder %s3981_s23, %s3977_s22  ;;  %p165_p2 = scmp.eq.s32.totalorder %s3056_s29, 3 }
   0xb   : > { %s5157_s7 = smov (%p33_p0, %s32_s7), 0  ;;  %s5159_s8 = smov (!%p33_p0, %s35_s8), %s3997_s27 }
   0xc   : > { %5128 = sst [smem:[#allocation10_spill]] %s5157_s7  ;;  %p4092_p3 = por %p165_p2, %p164_p1 }
   0xd   : > { %p170_p4 = scmp.ne.s32.totalorder %s3977_s22, %s3973_s21  ;;  %p37_p5 = scmp.ge.s32.totalorder %s5159_s8, 2 }
   0xe   : > { %p171_p6 = scmp.eq.s32.totalorder %s3057_s30, 3  ;;  %p3060_p7 = scmp.ge.s32.totalorder %s4001_s28, 1 }
   0xf   : > { %p239_p8 = scmp.lt.s32.totalorder %s4001_s28, 5  ;;  %s5161_s8 = smov (%p37_p5, %s5159_s8), 0 }
  0x10   : > { %5130 = sst [smem:[#allocation11_spill]] %s5161_s8  ;;  %p4102_p9 = por %p171_p6, %p170_p4 }
  0x11   : > { %p240_p10 = pnand %p3060_p7, %p239_p8  ;;  %s151_s11 = ssub.s32 %s3997_s27, %s5161_s8 }
  0x12   : > { %s154_s12 = sadd.s32 1, %s3981_s23  ;;  %p152_p11 = scmp.eq.s32.totalorder %s151_s11, 0 }
  0x13   : > { %243 = sbr.rel (%p240_p10) target bundleno = 735 (0x2df), region = 40 }
  0x14   : > { %s4110_s13 = scalar_select %p152_p11, %s3981_s23, %s154_s12  }
  0x1a   : > { %s4113_s14 = sand.u32 1, %s3977_s22   ;;  %p276_p12 = scmp.lt.s32.totalorder %s3989_s25, 1 }
  0x1b   : > { %p278_p13 = scmp.lt.s32.totalorder %s3985_s24, 1  ;;  %s269_s12 = scalar_lea.vmem [#allocation3], %s4113_s14 }
  0x1c   : > { %s277_s15 = scalar_select %p276_p12, %s3989_s25, 1 }
  0x1d   : > { %s279_s17 = scalar_select %p278_p13, %s3985_s24, 1 }
  0x1e   : > { %s3762_s16 = smul.u32 60, %s277_s15  ;;  %s275_s8 = scalar_lea.vmem [#allocation5], %s4113_s14 }
  0x1f   : > { %s3761_s18 = smul.u32 30, %s279_s17  ;;  %p3062_p0 = scmp.ne.s32.totalorder %s3985_s24, 0 }
  0x20   : > { %v4003_v0 = vmov (!%p3062_p0), 0.0  }
  0x21   : > { %s282_s19 = sadd.s32 %s3762_s16, %s3761_s18  ;;  %289 = sbr.rel (%p3062_p0) target bundleno = 40 (0x28), region = 44  ;;  %290 = vst [vmem:[#allocation2] sm:$0x1] (!%p3062_p0), %v4003_v0 }
  0x22   : > { %s3061_s20 = sshll.u32 %s282_s19, 2 }
  0x23   : > { %s4122_s11 = scalar_lea.vmem %s5114_s0, %s3061_s20 }
  0x28 PF: > { %v3063_v1 = vld [vmem:[%s5115_s1 + $0x2] sm:$0x3]  ;;  %vm562_vm0 = vcmask 1041408   ;;  %v3178_v2 = vld [vmem:[%s5115_s1 + $0x8] sm:$0x3]  ;;  %vm537_vm4 = vcmask 31744  }
  0x29   : > { %3751 = vmatprep.subr.msk.bf16.mxu1 %vm562_vm0, %v3063_v1  ;;  %3755 = vmatprep.subr.msk.bf16.mxu0 %vm562_vm0, %v3178_v2  ;;  %v564_v3 = vsel %vm562_vm0, %v3063_v1, 0  ;;  %v4137_v4 = vsel %vm562_vm0, %v3178_v2, 0  ;;  %v4140_v5 = vld [vmem:[%s4122_s11] sm:$0xf]  ;;  %v4143_v6 = vld [vmem:[%s4122_s11 + $0x4] sm:$0xf] }
  0x2a   : > { %3440 = vmatpush3.bf16.msra.mxu1 %v564_v3  ;;  %3512 = vmatpush3.bf16.msra.mxu0 %v4137_v4  ;;  %v4147_v7 = vld [vmem:[%s4122_s11 + $0x8] sm:$0x1]  ;;  %vm316_vm1 = vsmask.f32 3328  ;;  %vm317_vm2 = vsmask.f32 7440 }
  0x2b   : > { %v320_v8 = vshrl.u32 %v4140_v5, 16  ;;  %v323_v9 = vshll.u32 %v4140_v5, 16  ;;  %v329_v10 = vshll.u32 %v4143_v6, 16  ;;  %v333_v11 = vshrl.u32 %v4143_v6, 16  ;;  %v307_v12 = vld [vmem:[%s5115_s1] sm:$0x3]  ;;  %vm4180_vm3 = vmor %vm316_vm1, %vm317_vm2 }
  0x2c   : > { %v339_v13 = vshll.u32 %v4147_v7, 16  ;;  %3752 = vmatprep.subr.msk.bf16.mxu1 %vm562_vm0, %v307_v12  ;;  %v3154_v14 = vld [vmem:[%s4122_s11 + $0xc] sm:$0xf]  ;;  %v4160_v15 = vld [vmem:[%s4122_s11 + $0x10] sm:$0xf]  ;;  %v728_v2 = vsel %vm562_vm0, %v307_v12, 0 }
  0x2d   : > { %v322_v16 = vrot.slane %v320_v8, 4  ;;  %v325_v17 = vrot.slane %v323_v9, 5  ;;  %v331_v18 = vrot.slane %v329_v10, 5  ;;  %v335_v19 = vrot.slane %v333_v11, 4  ;;  %v4163_v20 = vld [vmem:[%s4122_s11 + $0x14] sm:$0x1] }
  0x2e   : > { %v341_v21 = vrot.slane %v339_v13, 5  ;;  %v1300_v22 = vshrl.u32 %v3154_v14, 16  ;;  %v1303_v23 = vshll.u32 %v3154_v14, 16  ;;  %v1309_v24 = vshll.u32 %v4160_v15, 16  ;;  %v4169_v25 = vld [vmem:[%s5115_s1 + $0xa] sm:$0x3] }
  0x2f   : > { %v326_v26 = vor.u32 %v325_v17, %v322_v16  ;;  %v336_v27 = vor.u32 %v335_v19, %v331_v18  ;;  %v1313_v28 = vshrl.u32 %v4160_v15, 16  ;;  %v1319_v29 = vshll.u32 %v4163_v20, 16  ;;  %3757 = vmatprep.subr.msk.bf16.mxu0 %vm562_vm0, %v4169_v25  ;;  %v4176_v30 = vld [vmem:[%s4122_s11 + $0xc] sm:$0xf]  ;;  %v4185_v35 = vld [vmem:[%s4122_s11 + $0x10] sm:$0xf] }
  0x30   : > { %v1302_v32 = vrot.slane %v1300_v22, 4  ;;  %v1305_v33 = vrot.slane %v1303_v23, 5  ;;  %v1311_v34 = vrot.slane %v1309_v24, 5  ;;  %v4188_v41 = vld [vmem:[%s4122_s11 + $0x14] sm:$0x1]  ;;  %v344_v42 = vshrl.u32 %v4176_v30, 16 }
  0x31   : > { %v327_v36 = vrot.slane %v326_v26, 4  ;;  %v337_v37 = vrot.slane %v336_v27, 4  ;;  %v1315_v38 = vrot.slane %v1313_v28, 4  ;;  %v1321_v40 = vrot.slane %v1319_v29, 5  ;;  %v3157_v56 = vld [vmem:[%s4122_s11 + $0x18] sm:$0xf] }
  0x32   : > { %v1306_v39 = vor.u32 %v1305_v33, %v1302_v32  ;;  %v347_v43 = vshll.u32 %v4176_v30, 16  ;;  %v353_v47 = vshll.u32 %v4185_v35, 16  ;;  %v346_v50 = vrot.slane %v344_v42, 4  ;;  %v4206_v61 = vld [vmem:[%s4122_s11 + $0x1c] sm:$0xf]  ;;  %p3336_p1 = scmp.ne.s32.totalorder %s3985_s24, 1 }
  0x33   : > { %v332_v44 = vsel %vm4180_vm3, %v327_v36, %v331_v18  ;;  %v342_v45 = vsel %vm4180_vm3, %v337_v37, %v341_v21  ;;  %v1316_v46 = vor.u32 %v1315_v38, %v1311_v34  ;;  %v357_v54 = vshrl.u32 %v4185_v35, 16  ;;  %v4209_v62 = vld [vmem:[%s4122_s11 + $0x20] sm:$0x1]  ;;  %v4222_v21 = vld [vmem:[%s4122_s11 + $0x18] sm:$0xf] }
  0x34   : > { %v3064_v48 = vcombine.low %v332_v44, %v342_v45  ;;  %v1307_v49 = vrot.slane %v1306_v39, 4  ;;  %v349_v51 = vrot.slane %v347_v43, 5  ;;  %v355_v53 = vrot.slane %v353_v47, 5  ;;  %v4225_v27 = vld [vmem:[%s4122_s11 + $0x1c] sm:$0xf] }
  0x35   : > { %v1317_v52 = vrot.slane %v1316_v46, 4  ;;  %v363_v55 = vshll.u32 %v4188_v41, 16  ;;  %v1691_v58 = vrot.slane %v4160_v15, 5  ;;  %v1694_v59 = vrot.slane %v4163_v20, 5  ;;  %v4981_v31 = vld [vmem:[%s5116_s2] ss:$0 sm:$0xff] }
  0x36   : > { %3441 = vmatprep.mubr.msk.bf16.mxu1 %vm537_vm4, %v3064_v48  ;;  %v1312_v57 = vsel %vm4180_vm3, %v1307_v49, %v1311_v34  ;;  %v350_v60 = vor.u32 %v349_v51, %v346_v50  ;;  %v359_v0 = vrot.slane %v357_v54, 4  ;;  %v1324_v9 = vshrl.u32 %v3157_v56, 16  ;;  %v4235_v34 = vld [vmem:[%s4122_s11 + $0x20] sm:$0x1]  ;;  %v4246_v49 = vld [vmem:[%s4122_s11 + $0x28] sm:$0xf] }
  0x37   : > { %v1322_v63 = vsel %vm4180_vm3, %v1317_v52, %v1321_v40  ;;  %v365_v1 = vrot.slane %v363_v55, 5  ;;  %v1327_v10 = vshll.u32 %v3157_v56, 16  ;;  %v1333_v13 = vshll.u32 %v4206_v61, 16  ;;  %v3160_v40 = vld [vmem:[%s4122_s11 + $0x24] sm:$0xf] }
  0x38   : > { %v3179_v3 = vcombine.low %v1312_v57, %v1322_v63  ;;  %v351_v8 = vrot.slane %v350_v60, 4  ;;  %v360_v11 = vor.u32 %v359_v0, %v355_v53  ;;  %v1337_v14 = vshrl.u32 %v4206_v61, 16  ;;  %v4257_v63 = vld [vmem:[%s4122_s11 + $0x24] sm:$0xf] }
  0x39   : > { %v1343_v16 = vshll.u32 %v4209_v62, 16  ;;  %v1326_v18 = vrot.slane %v1324_v9, 4  ;;  %v1329_v12 = vrot.slane %v1327_v10, 5  ;;  %v1698_v19 = vrot.slane %v4206_v61, 5  ;;  %v4261_v9 = vld [vmem:[%s4122_s11 + $0x28] sm:$0xf] }
  0x3a   : > { %3513 = vmatprep.mubr.msk.bf16.mxu0 %vm537_vm4, %v3179_v3  ;;  %v356_v17 = vsel %vm4180_vm3, %v351_v8, %v355_v53  ;;  %v361_v22 = vrot.slane %v360_v11, 4  ;;  %v1335_v23 = vrot.slane %v1333_v13, 5  ;;  %v1339_v24 = vrot.slane %v1337_v14, 4  ;;  %v4252_v53 = vld [vmem:[%s4122_s11 + $0x2c] sm:$0x1] }
  0x3b   : > { %v1345_v26 = vrot.slane %v1343_v16, 5  ;;  %v1330_v28 = vor.u32 %v1329_v12, %v1326_v18  ;;  %v4229_v29 = vrot.slane %v1698_v19, 4  ;;  %v1701_v32 = vrot.slane %v4209_v62, 5  ;;  %v4268_v14 = vld [vmem:[%s5115_s1 + $0xc] sm:$0x3] }
  0x3c   : > { %v1796_v33 = vsel %vm562_vm0, %v4169_v25, 0  ;;  %v366_v36 = vsel %vm4180_vm3, %v361_v22, %v365_v1  ;;  %v1340_v37 = vor.u32 %v1339_v24, %v1335_v23  ;;  %v368_v38 = vshrl.u32 %v4222_v21, 16 }
  0x3d   : > { %v371_v39 = vshll.u32 %v4222_v21, 16  ;;  %v3065_v42 = vcombine.low %v356_v17, %v366_v36  ;;  %v1331_v43 = vrot.slane %v1330_v28, 4  ;;  %v377_v44 = vshll.u32 %v4225_v27, 16  ;;  %v4276_v28 = vld [vmem:[%s4122_s11 + $0x2c] sm:$0x1] }
  0x3e   : > { %v381_v45 = vshrl.u32 %v4225_v27, 16  ;;  %v1341_v46 = vrot.slane %v1340_v37, 4  ;;  %v370_v25 = vrot.slane %v368_v38, 4  ;;  %v387_v48 = vshll.u32 %v4235_v34, 16  ;;  %v3163_v36 = vld [vmem:[%s4122_s11 + $0x30] sm:$0xf] }
  0x3f   : > { %v373_v47 = vrot.slane %v371_v39, 5  ;;  %3442 = vmatmul.mubr.msk.bf16.vlgmr.msra.gmra.mrb[0].mxu1 %vm537_vm4, %v3065_v42  ;;  %v1336_v50 = vsel %vm4180_vm3, %v1331_v43, %v1335_v23  ;;  %v379_v51 = vrot.slane %v377_v44, 5  ;;  %v1348_v54 = vshrl.u32 %v3160_v40, 16 }
  0x40   : > { %v383_v52 = vrot.slane %v381_v45, 4  ;;  %3458 = vmatpush3.bf16.msra.mxu1 %v728_v2  ;;  %v1346_v55 = vsel %vm4180_vm3, %v1341_v46, %v1345_v26  ;;  %v389_v57 = vrot.slane %v387_v48, 5  ;;  %v1351_v60 = vshll.u32 %v3160_v40, 16  ;;  %v4286_v45 = vld [vmem:[%s4122_s11 + $0x34] sm:$0xf] }
  0x41   : > { %v374_v56 = vor.u32 %v373_v47, %v370_v25  ;;  %v3180_v0 = vcombine.low %v1336_v50, %v1346_v55  ;;  %v1350_v3 = vrot.slane %v1348_v54, 4  ;;  %v1357_v8 = vshll.u32 %v4246_v49, 16  ;;  %v4290_v48 = vld [vmem:[%s4122_s11 + $0x38] sm:$0x1] }
  0x42   : > { %v384_v1 = vor.u32 %v383_v52, %v379_v51  ;;  %v1353_v11 = vrot.slane %v1351_v60, 5  ;;  %v1361_v2 = vshrl.u32 %v4246_v49, 16  ;;  %v1367_v13 = vshll.u32 %v4252_v53, 16 }
  0x43   : > { %v375_v10 = vrot.slane %v374_v56, 4  ;;  %3514 = vmatmul.mubr.msk.bf16.vlgmr.msra.gmra.mrb[0].mxu0 %vm537_vm4, %v3180_v0  ;;  %v1359_v17 = vrot.slane %v1357_v8, 5  ;;  %v392_v18 = vshrl.u32 %v4257_v63, 16  ;;  %v395_v12 = vshll.u32 %v4257_v63, 16  ;;  %v4296_v56 = vld [vmem:[%s4122_s11 + $0x30] sm:$0xf] }
  0x44   : > { %v385_v16 = vrot.slane %v384_v1, 4  ;;  %3530 = vmatpush3.bf16.msra.mxu0 %v1796_v33  ;;  %v1354_v23 = vor.u32 %v1353_v11, %v1350_v3  ;;  %v1363_v24 = vrot.slane %v1361_v2, 4  ;;  %v1369_v26 = vrot.slane %v1367_v13, 5  ;;  %v4302_v3 = vld [vmem:[%s5115_s1 + $0x4] sm:$0x3] }
  0x45   : > { %v380_v22 = vsel %vm4180_vm3, %v375_v10, %v379_v51  ;;  %v394_v38 = vrot.slane %v392_v18, 4  ;;  %v397_v39 = vrot.slane %v395_v12, 5  ;;  %v401_v40 = vshll.u32 %v4261_v9, 16  ;;  %3758 = vmatprep.subr.msk.bf16.mxu0 %vm562_vm0, %v4268_v14  ;;  %v4308_v13 = vld [vmem:[%s4122_s11 + $0x34] sm:$0xf]  ;;  %3753 = vmatprep.subr.msk.bf16.mxu1 %vm562_vm0, %v4302_v3 }
  0x46   : > { %v390_v37 = vsel %vm4180_vm3, %v385_v16, %v389_v57  ;;  %v1355_v42 = vrot.slane %v1354_v23, 4  ;;  %v1364_v43 = vor.u32 %v1363_v24, %v1359_v17  ;;  %v405_v44 = vshrl.u32 %v4261_v9, 16 }
  0x47   : > { %v3066_v33 = vcombine.low %v380_v22, %v390_v37  ;;  %v398_v46 = vor.u32 %v397_v39, %v394_v38  ;;  %v403_v25 = vrot.slane %v401_v40, 5  ;;  %v411_v47 = vshll.u32 %v4276_v28, 16  ;;  %v4318_v37 = vld [vmem:[%s4122_s11 + $0x38] sm:$0x1] }
  0x48   : > { %v1372_v50 = vshrl.u32 %v3163_v36, 16  ;;  %v1360_v51 = vsel %vm4180_vm3, %v1355_v42, %v1359_v17  ;;  %v1365_v52 = vrot.slane %v1364_v43, 4  ;;  %v407_v54 = vrot.slane %v405_v44, 4 }
  0x49   : > { %3445 = vmatprep.mubr.msk.bf16.mxu1 %vm537_vm4, %v3066_v33  ;;  %v1375_v55 = vshll.u32 %v3163_v36, 16  ;;  %v399_v57 = vrot.slane %v398_v46, 4  ;;  %v413_v60 = vrot.slane %v411_v47, 5  ;;  %v1381_v1 = vshll.u32 %v4286_v45, 16  ;;  %v3195_v46 = vld [vmem:[%s4122_s11 + $0xc] sm:$0xe] }
  0x4a   : > { %v1374_v0 = vrot.slane %v1372_v50, 4  ;;  %v1370_v8 = vsel %vm4180_vm3, %v1365_v52, %v1369_v26  ;;  %v408_v10 = vor.u32 %v407_v54, %v403_v25  ;;  %v1385_v2 = vshrl.u32 %v4286_v45, 16  ;;  %v4327_v52 = vld [vmem:[%s4122_s11 + $0x3c] sm:$0xf] }
  0x4b   : > { %v1377_v11 = vrot.slane %v1375_v55, 5  ;;  %v3181_v16 = vcombine.low %v1360_v51, %v1370_v8  ;;  %v404_v17 = vsel %vm4180_vm3, %v399_v57, %v403_v25  ;;  %v1383_v18 = vrot.slane %v1381_v1, 5  ;;  %v4334_v8 = vld [vmem:[%s4122_s11 + $0x40] sm:$0xf] }
  0x4c   : > { %v1391_v12 = vshll.u32 %v4290_v48, 16  ;;  %v409_v22 = vrot.slane %v408_v10, 4  ;;  %v1387_v24 = vrot.slane %v1385_v2, 4  ;;  %v416_v26 = vshrl.u32 %v4296_v56, 16  ;;  %v4337_v10 = vld [vmem:[%s4122_s11 + $0x44] sm:$0x1] }
  0x4d   : > { %v1378_v23 = vor.u32 %v1377_v11, %v1374_v0  ;;  %3517 = vmatprep.mubr.msk.bf16.mxu0 %vm537_vm4, %v3181_v16  ;;  %v419_v38 = vshll.u32 %v4296_v56, 16  ;;  %v425_v39 = vshll.u32 %v4308_v13, 16  ;;  %v429_v40 = vshrl.u32 %v4308_v13, 16 }
  0x4e   : > { %v1393_v36 = vrot.slane %v1391_v12, 5  ;;  %v414_v33 = vsel %vm4180_vm3, %v409_v22, %v413_v60  ;;  %v1388_v43 = vor.u32 %v1387_v24, %v1383_v18  ;;  %v418_v44 = vrot.slane %v416_v26, 4  ;;  %v3196_v12 = vld [vmem:[%s4122_s11 + $0x18] sm:$0xe] }
  0x4f   : > { %v1379_v42 = vrot.slane %v1378_v23, 4  ;;  %v3067_v25 = vcombine.low %v404_v17, %v414_v33  ;;  %v421_v47 = vrot.slane %v419_v38, 5  ;;  %v427_v50 = vrot.slane %v425_v39, 5 }
  0x50   : > { %v431_v51 = vrot.slane %v429_v40, 4  ;;  %v1389_v55 = vrot.slane %v1388_v43, 4  ;;  %v435_v57 = vshll.u32 %v4318_v37, 16  ;;  %vm851_vm5 = vcmask 1042432  }
  0x51   : > { %v1384_v54 = vsel %vm4180_vm3, %v1379_v42, %v1383_v18  ;;  %3446 = vmatmul.mubr.msk.bf16.gmra.mrb[4].mxu1 %vm537_vm4, %v3067_v25  ;;  %v422_v60 = vor.u32 %v421_v47, %v418_v44  ;;  %vm852_vm6 = vcmask 1046532   ;;  %v3203_v1 = vrot.slane %v3195_v46, 9  ;;  %v4363_v42 = vld [vmem:[%s4122_s11 + $0x4c] sm:$0xf]  ;;  %v4373_v47 = vld [vmem:[%s4122_s11 + $0x50] sm:$0x1] }
  0x52   : > { %v432_v0 = vor.u32 %v431_v51, %v427_v50  ;;  %v1394_v11 = vsel %vm4180_vm3, %v1389_v55, %v1393_v36  ;;  %v437_v2 = vrot.slane %v435_v57, 5  ;;  %vm4341_vm7 = vmor %vm851_vm5, %vm852_vm6  ;;  %v1693_v17 = vrot.slane %v1691_v58, 4  ;;  %v4354_v36 = vld [vmem:[%s4122_s11 + $0x48] sm:$0xf] }
  0x53   : > { %v440_v18 = vshrl.u32 %v4327_v52, 16  ;;  %v3182_v22 = vcombine.low %v1384_v54, %v1394_v11  ;;  %v423_v23 = vrot.slane %v422_v60, 4  ;;  %v1692_v26 = vsel %vm4341_vm7, %v3203_v1, %v1691_v58 }
  0x54   : > { %v433_v24 = vrot.slane %v432_v0, 4  ;;  %v1695_v38 = vsel %vm4341_vm7, %v1693_v17, %v1694_v59  ;;  %v443_v40 = vshll.u32 %v4327_v52, 16  ;;  %v449_v33 = vshll.u32 %v4334_v8, 16 }
  0x55   : > { %v442_v39 = vrot.slane %v440_v18, 4  ;;  %3518 = vmatmul.mubr.msk.bf16.gmra.mrb[4].mxu0 %vm537_vm4, %v3182_v22  ;;  %v428_v15 = vsel %vm4180_vm3, %v423_v23, %v427_v50  ;;  %v3212_v43 = vcombine.low %v1692_v26, %v1695_v38  ;;  %v453_v20 = vshrl.u32 %v4334_v8, 16  ;;  %v4394_v22 = vld [vmem:[%s4122_s11 + $0x54] sm:$0xf]  ;;  %v4397_v23 = vld [vmem:[%s4122_s11 + $0x58] sm:$0xf] }
  0x56   : > { %v438_v58 = vsel %vm4180_vm3, %v433_v24, %v437_v2  ;;  %v445_v59 = vrot.slane %v443_v40, 5  ;;  %v451_v46 = vrot.slane %v449_v33, 5  ;;  %v459_v25 = vshll.u32 %v4337_v10, 16 }
  0x57   : > { %v3068_v44 = vcombine.low %v428_v15, %v438_v58  ;;  %3531 = vmatprep.mubr.msk.bf16.mxu0 %vm537_vm4, %v3212_v43  ;;  %v455_v51 = vrot.slane %v453_v20, 4  ;;  %v3204_v54 = vrot.slane %v3196_v12, 9  ;;  %v1702_v50 = vsel %vm4341_vm7, %v4229_v29, %v1701_v32  ;;  %v4406_v15 = vld [vmem:[%s5115_s1 + $0xe] sm:$0x3] }
  0x58   : > { %v1995_v55 = vsel %vm562_vm0, %v4268_v14, 0  ;;  %v446_v57 = vor.u32 %v445_v59, %v442_v39  ;;  %v461_v60 = vrot.slane %v459_v25, 5  ;;  %v464_v0 = vshrl.u32 %v4354_v36, 16  ;;  %v3197_v14 = vld [vmem:[%s4122_s11 + $0x24] sm:$0xe] }
  0x59   : > { %3449 = vmatprep.mubr.msk.bf16.mxu1 %vm537_vm4, %v3068_v44  ;;  %v467_v1 = vshll.u32 %v4354_v36, 16  ;;  %v456_v11 = vor.u32 %v455_v51, %v451_v46  ;;  %v1699_v62 = vsel %vm4341_vm7, %v3204_v54, %v1698_v19  ;;  %v473_v29 = vshll.u32 %v4363_v42, 16  ;;  %v4413_v59 = vld [vmem:[%s4122_s11 + $0x5c] sm:$0x1]  ;;  %v3198_v54 = vld [vmem:[%s4122_s11 + $0x30] sm:$0xe] }
  0x5a   : > { %v477_v32 = vshrl.u32 %v4363_v42, 16  ;;  %v447_v2 = vrot.slane %v446_v57, 4  ;;  %v3213_v17 = vcombine.low %v1699_v62, %v1702_v50  ;;  %v466_v18 = vrot.slane %v464_v0, 4 }
  0x5b   : > { %v469_v12 = vrot.slane %v467_v1, 5  ;;  %v457_v24 = vrot.slane %v456_v11, 4  ;;  %v475_v26 = vrot.slane %v473_v29, 5  ;;  %v483_v38 = vshll.u32 %v4373_v47, 16 }
  0x5c   : > { %v479_v61 = vrot.slane %v477_v32, 4  ;;  %v452_v19 = vsel %vm4180_vm3, %v447_v2, %v451_v46  ;;  %v3205_v40 = vrot.slane %v3197_v14, 9  ;;  %v1705_v33 = vrot.slane %v4246_v49, 5 }
  0x5d   : > { %v470_v39 = vor.u32 %v469_v12, %v466_v18  ;;  %v462_v58 = vsel %vm4180_vm3, %v457_v24, %v461_v60  ;;  %3532 = vmatmul.mubr.msk.bf16.vlgmr.msra.gmra.mrb[0].mxu0 %vm537_vm4, %v3213_v17  ;;  %v485_v20 = vrot.slane %v483_v38, 5  ;;  %v1708_v44 = vrot.slane %v4252_v53, 5  ;;  %v4422_v53 = vld [vmem:[%s4122_s11 + $0x40] sm:$0xf]  ;;  %v4436_v17 = vld [vmem:[%s4122_s11 + $0x44] sm:$0x1] }
  0x5e   : > { %v480_v43 = vor.u32 %v479_v61, %v475_v26  ;;  %v3069_v46 = vcombine.low %v452_v19, %v462_v58  ;;  %3548 = vmatpush3.bf16.msra.mxu0 %v1995_v55  ;;  %v1706_v25 = vsel %vm4341_vm7, %v3205_v40, %v1705_v33  ;;  %v1707_v51 = vrot.slane %v1705_v33, 4  ;;  %v3199_v18 = vld [vmem:[%s4122_s11 + $0x3c] sm:$0xe] }
  0x5f   : > { %v471_v49 = vrot.slane %v470_v39, 4  ;;  %v488_v57 = vshrl.u32 %v4394_v22, 16  ;;  %v491_v60 = vshll.u32 %v4394_v22, 16  ;;  %v497_v0 = vshll.u32 %v4397_v23, 16  ;;  %3759 = vmatprep.subr.msk.bf16.mxu0 %vm562_vm0, %v4406_v15 }
  0x60   : > { %v481_v50 = vrot.slane %v480_v43, 4  ;;  %3450 = vmatmul.mubr.msk.bf16.gmra.mrb[8].mxu1 %vm537_vm4, %v3069_v46  ;;  %v1709_v1 = vsel %vm4341_vm7, %v1707_v51, %v1708_v44  ;;  %v501_v11 = vshrl.u32 %v4397_v23, 16  ;;  %v507_v62 = vshll.u32 %v4413_v59, 16 }
  0x61   : > { %v476_v55 = vsel %vm4180_vm3, %v471_v49, %v475_v26  ;;  %v3214_v32 = vcombine.low %v1706_v25, %v1709_v1  ;;  %v490_v14 = vrot.slane %v488_v57, 4  ;;  %v493_v2 = vrot.slane %v491_v60, 5  ;;  %v4457_v57 = vld [vmem:[%s4122_s11 + $0x50] sm:$0x1]  ;;  %v3200_v60 = vld [vmem:[%s4122_s11 + $0x48] sm:$0xe] }
  0x62   : > { %v486_v29 = vsel %vm4180_vm3, %v481_v50, %v485_v20  ;;  %v499_v24 = vrot.slane %v497_v0, 5  ;;  %v503_v61 = vrot.slane %v501_v11, 4  ;;  %v509_v26 = vrot.slane %v507_v62, 5  ;;  %v4454_v50 = vld [vmem:[%s4122_s11 + $0x4c] sm:$0xf] }
  0x63   : > { %v3070_v12 = vcombine.low %v476_v55, %v486_v29  ;;  %3535 = vmatprep.mubr.msk.bf16.mxu0 %vm537_vm4, %v3214_v32  ;;  %v494_v38 = vor.u32 %v493_v2, %v490_v14  ;;  %v3206_v19 = vrot.slane %v3198_v54, 9  ;;  %v1712_v39 = vrot.slane %v4286_v45, 5  ;;  %v4467_v62 = vld [vmem:[%s4122_s11 + $0x58] sm:$0xf]  ;;  %v3201_v29 = vld [vmem:[%s4122_s11 + $0x54] sm:$0xe] }
  0x64   : > { %v1715_v40 = vrot.slane %v4290_v48, 5  ;;  %v504_v33 = vor.u32 %v503_v61, %v499_v24  ;;  %v3207_v58 = vrot.slane %v3199_v18, 9  ;;  %v1719_v43 = vrot.slane %v4422_v53, 5  ;;  %v4471_v2 = vld [vmem:[%s4122_s11 + $0x5c] sm:$0x1] }
  0x65   : > { %3453 = vmatprep.mubr.msk.bf16.mxu1 %vm537_vm4, %v3070_v12  ;;  %v1722_v20 = vrot.slane %v4436_v17, 5  ;;  %v495_v44 = vrot.slane %v494_v38, 4  ;;  %v1713_v46 = vsel %vm4341_vm7, %v3206_v19, %v1712_v39  ;;  %v1714_v49 = vrot.slane %v1712_v39, 4  ;;  %5136 = vst [vmem:[#allocation12_spill] sm:$0xff] %v4471_v2  ;;  %v4483_v38 = vld [vmem:[%s4122_s11 + $0x68] sm:$0x1] }
  0x66   : > { %v505_v45 = vrot.slane %v504_v33, 4  ;;  %v1720_v48 = vsel %vm4341_vm7, %v3207_v58, %v1719_v43  ;;  %v1721_v25 = vrot.slane %v1719_v43, 4  ;;  %v3080_v1 = vcombine.low %v4140_v5, %v4143_v6  ;;  %v4477_v5 = vld [vmem:[%s4122_s11 + $0x64] sm:$0xf]  ;;  %5138 = vst [vmem:[#allocation14_spill] sm:$0xff] %v4483_v38 }
  0x67   : > { %v500_v51 = vsel %vm4180_vm3, %v495_v44, %v499_v24  ;;  %v1716_v54 = vsel %vm4341_vm7, %v1714_v49, %v1715_v40  ;;  %v3208_v18 = vrot.slane %v3200_v60, 9  ;;  %v1726_v12 = vrot.slane %v4454_v50, 5  ;;  %5137 = vst [vmem:[#allocation13_spill] sm:$0xff] %v4477_v5  ;;  %v3202_v19 = vld [vmem:[%s4122_s11 + $0x60] sm:$0xe] }
  0x68   : > { %v510_v0 = vsel %vm4180_vm3, %v505_v45, %v509_v26  ;;  %v3215_v55 = vcombine.low %v1713_v46, %v1716_v54  ;;  %v1723_v11 = vsel %vm4341_vm7, %v1721_v25, %v1722_v20  ;;  %v1729_v24 = vrot.slane %v4457_v57, 5  ;;  %v828_v45 = vld [vmem:[%s4122_s11 + $0xc] sm:$0xe] }
  0x69   : > { %v3071_v32 = vcombine.low %v500_v51, %v510_v0  ;;  %v3216_v14 = vcombine.low %v1720_v48, %v1723_v11  ;;  %v3209_v61 = vrot.slane %v3201_v29, 9  ;;  %v1733_v26 = vrot.slane %v4467_v62, 5  ;;  %v829_v48 = vld [vmem:[%s4122_s11 + $0x18] sm:$0xe]  ;;  %v830_v29 = vld [vmem:[%s4122_s11 + $0x24] sm:$0xe] }
  0x6a   : > { %3536 = vmatmul.mubr.msk.bf16.gmra.mrb[4].mxu0 %vm537_vm4, %v3215_v55  ;;  %v1727_v39 = vsel %vm4341_vm7, %v3208_v18, %v1726_v12  ;;  %v1728_v40 = vrot.slane %v1726_v12, 4  ;;  %v1736_v33 = vrot.slane %v4471_v2, 5  ;;  %v863_v20 = vrot.slane %v4185_v35, 5  ;;  %v831_v12 = vld [vmem:[%s4122_s11 + $0x30] sm:$0xe] }
  0x6b   : > { %3454 = vmatmul.mubr.msk.bf16.gmra.mrb[12].mxu1 %vm537_vm4, %v3071_v32  ;;  %3539 = vmatprep.mubr.msk.bf16.mxu0 %vm537_vm4, %v3216_v14  ;;  %v1734_v58 = vsel %vm4341_vm7, %v3209_v61, %v1733_v26  ;;  %v1735_v43 = vrot.slane %v1733_v26, 4  ;;  %v3081_v44 = vcombine.low %v4176_v30, %v4185_v35  ;;  %v1740_v49 = vrot.slane %v4477_v5, 5  ;;  %v4513_v32 = vld [vmem:[%s5115_s1 + $0x6] sm:$0x3]  ;;  %v4790_v2 = vld [vmem:[%s4122_s11 + $0x70] sm:$0xf] }
  0x6c   : > { %3459 = vmatprep.mubr.msk.bf16.mxu1 %vm537_vm4, %v3080_v1  ;;  %v1730_v46 = vsel %vm4341_vm7, %v1728_v40, %v1729_v24  ;;  %v3210_v54 = vrot.slane %v3202_v19, 9  ;;  %v1743_v60 = vrot.slane %v4483_v38, 5  ;;  %v866_v0 = vrot.slane %v4188_v41, 5 }
  0x6d   : > { %v3217_v25 = vcombine.low %v1727_v39, %v1730_v46  ;;  %v1737_v51 = vsel %vm4341_vm7, %v1735_v43, %v1736_v33  ;;  %v3082_v30 = vcombine.low %v4222_v21, %v4225_v27  ;;  %v1742_v55 = vrot.slane %v1740_v49, 4 }
  0x6e   : > { %v3218_v35 = vcombine.low %v1734_v58, %v1737_v51  ;;  %v961_v1 = vsel %vm562_vm0, %v4302_v3, 0  ;;  %v3097_v11 = vrot.slane %v828_v45, 9  ;;  %v865_v14 = vrot.slane %v863_v20, 4  ;;  %v832_v51 = vld [vmem:[%s4122_s11 + $0x3c] sm:$0xe] }
  0x6f   : > { %v3098_v41 = vrot.slane %v829_v48, 9  ;;  %v1741_v21 = vsel %vm4341_vm7, %v3210_v54, %v1740_v49  ;;  %v1744_v3 = vsel %vm4341_vm7, %v1742_v55, %v1743_v60  ;;  %v870_v61 = vrot.slane %v4225_v27, 5 }
  0x70   : > { %v4523_v18 = vsel %vm4341_vm7, %v3097_v11, %v863_v20  ;;  %v4529_v24 = vsel %vm4341_vm7, %v865_v14, %v866_v0  ;;  %v873_v26 = vrot.slane %v4235_v34, 5  ;;  %v3099_v19 = vrot.slane %v830_v29, 9  ;;  %v3849_v14 = vld [vmem:[%s4122_s11 + $0x24] sm:$0xff]  }
  0x71   : > { %v3083_v39 = vcombine.low %v4257_v63, %v4261_v9  ;;  %v3106_v40 = vcombine.low %v4523_v18, %v4529_v24  ;;  %v877_v33 = vrot.slane %v4261_v9, 5  ;;  %v880_v58 = vrot.slane %v4276_v28, 5  ;;  %v827_v28 = vld [vmem:[%s4122_s11] sm:$0xe]  ;;  %v3857_v18 = vld [vmem:[%s4122_s11 + $0x6c] sm:$0xff]  }
  0x72   : > { %3540 = vmatmul.mubr.msk.bf16.gmra.mrb[8].mxu0 %vm537_vm4, %v3217_v25  ;;  %v3219_v43 = vcombine.low %v1741_v21, %v1744_v3  ;;  %v4543_v27 = vsel %vm4341_vm7, %v3098_v41, %v870_v61  ;;  %v872_v34 = vrot.slane %v870_v61, 4  ;;  %v3100_v20 = vrot.slane %v831_v12, 9  ;;  %v3261_v41 = vld [vmem:[%s4122_s11 + $0x18] sm:$0xf]  ;;  %v4595_v61 = vld [vmem:[%s4122_s11 + $0x1c] sm:$0xf] }
  0x73   : > { %3460 = vmatmul.mubr.msk.bf16.vlgmr.msra.gmra.mrb[0].mxu1 %vm537_vm4, %v3081_v44  ;;  %3543 = vmatprep.mubr.msk.bf16.mxu0 %vm537_vm4, %v3218_v35  ;;  %v3847_v44 = vld [vmem:[%s4122_s11 + $0x18] sm:$0xff]   ;;  %v4548_v63 = vsel %vm4341_vm7, %v3099_v19, %v877_v33  ;;  %v879_v46 = vrot.slane %v877_v33, 4  ;;  %v884_v49 = vrot.slane %v4308_v13, 5  ;;  %v887_v45 = vrot.slane %v4318_v37, 5 }
  0x74   : > { %3476 = vmatpush3.bf16.msra.mxu1 %v961_v1  ;;  %3463 = vmatprep.mubr.msk.bf16.mxu1 %vm537_vm4, %v3082_v30  ;;  %v3084_v9 = vcombine.low %v4296_v56, %v4308_v13  ;;  %v856_v48 = vrot.slane %v4143_v6, 5  ;;  %v4558_v25 = vsel %vm4341_vm7, %v872_v34, %v873_v26  ;;  %v3101_v0 = vrot.slane %v832_v51, 9  ;;  %v833_v26 = vld [vmem:[%s4122_s11 + $0x48] sm:$0xe]  ;;  %v4619_v34 = vld [vmem:[%s5115_s1 + $0x10] sm:$0x3] }
  0x75   : > { %3754 = vmatprep.subr.msk.bf16.mxu1 %vm562_vm0, %v4513_v32  ;;  %v4565_v60 = vsel %vm4341_vm7, %v879_v46, %v880_v58  ;;  %v4569_v37 = vsel %vm4341_vm7, %v3100_v20, %v884_v49  ;;  %v886_v56 = vrot.slane %v884_v49, 4  ;;  %v3096_v30 = vrot.slane %v827_v28, 9  ;;  %v3264_v49 = vld [vmem:[%s4122_s11 + $0x24] sm:$0xf] }
  0x76   : > { %v891_v55 = vrot.slane %v4334_v8, 5  ;;  %v894_v1 = vrot.slane %v4337_v10, 5  ;;  %v859_v11 = vrot.slane %v4147_v7, 5  ;;  %v858_v29 = vrot.slane %v856_v48, 4  ;;  %v3851_v10 = vld [vmem:[%s4122_s11 + $0x30] sm:$0xff]  }
  0x77   : > { %v4578_v13 = vsel %vm4341_vm7, %v886_v56, %v887_v45  ;;  %v3085_v12 = vcombine.low %v4327_v52, %v4334_v8  ;;  %v2377_v19 = vsel %vm562_vm0, %v4406_v15, 0  ;;  %v3086_v7 = vcombine.low %v4354_v36, %v4363_v42  ;;  %v4628_v45 = vld [vmem:[%s4122_s11 + $0x28] sm:$0xf]  ;;  %v3267_v56 = vld [vmem:[%s4122_s11 + $0x30] sm:$0xf] }
  0x78   : > { %v4590_v21 = vsel %vm4341_vm7, %v3101_v0, %v891_v55  ;;  %v893_v3 = vrot.slane %v891_v55, 4  ;;  %v860_v52 = vsel %vm4341_vm7, %v858_v29, %v859_v11  ;;  %v2135_v8 = vshrl.u32 %v3261_v41, 16  ;;  %v834_v0 = vld [vmem:[%s4122_s11 + $0x54] sm:$0xe]  ;;  %v3273_v15 = vld [vmem:[%s4122_s11 + $0x48] sm:$0xf] }
  0x79   : > { %v2138_v58 = vshll.u32 %v3261_v41, 16  ;;  %v2144_v36 = vshll.u32 %v4595_v61, 16  ;;  %v3102_v20 = vrot.slane %v833_v26, 9  ;;  %v901_v46 = vrot.slane %v4373_v47, 5  ;;  %v3854_v41 = vld [vmem:[%s4122_s11 + $0x48] sm:$0xff]  }
  0x7a   : > { %3544 = vmatmul.mubr.msk.bf16.gmra.mrb[12].mxu0 %vm537_vm4, %v3219_v43  ;;  %v4607_v33 = vsel %vm4341_vm7, %v893_v3, %v894_v1  ;;  %v2148_v43 = vshrl.u32 %v4595_v61, 16  ;;  %v1429_v28 = vshll.u32 %v4454_v50, 16  ;;  %v3087_v47 = vcombine.low %v4394_v22, %v4397_v23  ;;  %v4653_v22 = vld [vmem:[%s4122_s11 + $0x20] sm:$0x1] }
  0x7b   : > { %3464 = vmatmul.mubr.msk.bf16.gmra.mrb[4].mxu1 %vm537_vm4, %v3083_v39  ;;  %3549 = vmatprep.mubr.msk.bf16.mxu0 %vm537_vm4, %v3847_v44  ;;  %v857_v39 = vsel %vm4341_vm7, %v3096_v30, %v856_v48  ;;  %v898_v44 = vrot.slane %v4363_v42, 5  ;;  %v2137_v51 = vrot.slane %v2135_v8, 4  ;;  %v3853_v30 = vld [vmem:[%s4122_s11 + $0x3c] sm:$0xff]   ;;  %v2140_v55 = vrot.slane %v2138_v58, 5 }
  0x7c   : > { %3467 = vmatprep.mubr.msk.bf16.mxu1 %vm537_vm4, %v3084_v9  ;;  %v3105_v48 = vcombine.low %v857_v39, %v860_v52  ;;  %v4642_v1 = vrot.slane %v2144_v36, 5  ;;  %v2150_v11 = vrot.slane %v2148_v43, 4  ;;  %v2159_v3 = vshrl.u32 %v3264_v49, 16 }
  0x7d   : > { %v4632_v9 = vsel %vm4341_vm7, %v3102_v20, %v898_v44  ;;  %v900_v42 = vrot.slane %v898_v44, 4  ;;  %v2168_v26 = vshll.u32 %v4628_v45, 16  ;;  %v2186_v39 = vshll.u32 %v3267_v56, 16 }
  0x7e   : > { %v3103_v52 = vrot.slane %v834_v0, 9  ;;  %v905_v36 = vrot.slane %v4397_v23, 5  ;;  %v908_v43 = vrot.slane %v4413_v59, 5  ;;  %v1433_v20 = vshrl.u32 %v4454_v50, 16  ;;  %v3855_v50 = vld [vmem:[%s4122_s11 + $0x54] sm:$0xff]  }
  0x7f   : > { %v4646_v29 = vsel %vm4341_vm7, %v900_v42, %v901_v46  ;;  %v2141_v44 = vor.u32 %v2140_v55, %v2137_v51  ;;  %v2151_v46 = vor.u32 %v2150_v11, %v4642_v1  ;;  %v2161_v42 = vrot.slane %v2159_v3, 4  ;;  %v4676_v51 = vld [vmem:[%s4122_s11 + $0x2c] sm:$0x1]  ;;  %v4684_v3 = vld [vmem:[%s4122_s11 + $0x38] sm:$0x1] }
  0x80   : > { %v4671_v23 = vsel %vm4341_vm7, %v3103_v52, %v905_v36  ;;  %v907_v59 = vrot.slane %v905_v36, 4  ;;  %v4678_v0 = vrot.slane %v2168_v26, 5  ;;  %v2188_v55 = vrot.slane %v2186_v39, 5 }
  0x81   : > { %v4680_v11 = vrot.slane %v1429_v28, 5  ;;  %v4692_v36 = vrot.slane %v1433_v20, 4  ;;  %v2142_v26 = vrot.slane %v2141_v44, 4  ;;  %v4698_v28 = vld [vmem:[%s4122_s11 + $0x40] sm:$0xf]  ;;  %v1160_v39 = vsel %vm562_vm0, %v4513_v32, 0 }
  0x82   : > { %3550 = vmatmul.mubr.msk.bf16.vlgmr.msra.gmra.mrb[0].mxu0 %vm537_vm4, %v3849_v14  ;;  %v4649_v14 = vld [vmem:[%s4122_s11 + $0x34] sm:$0xf]  ;;  %v2202_v44 = vshll.u32 %v4684_v3, 16  ;;  %v2216_v32 = vshll.u32 %v4698_v28, 16  ;;  %vm4005_vm8 = vmmov (!%p3336_p1), 0  }
  0x83   : > { %3468 = vmatmul.mubr.msk.bf16.gmra.mrb[8].mxu1 %vm537_vm4, %v3085_v12  ;;  %3566 = vmatpush3.bf16.msra.mxu0 %v2377_v19  ;;  %v2162_v12 = vshll.u32 %v3264_v49, 16  ;;  %v2192_v8 = vshll.u32 %v4649_v14, 16  ;;  %v2196_v58 = vshrl.u32 %v4649_v14, 16  ;;  %v2154_v49 = vshll.u32 %v4653_v22, 16 }
  0x84   : > { %3471 = vmatprep.mubr.msk.bf16.mxu1 %vm537_vm4, %v3086_v7  ;;  %3553 = vmatprep.mubr.msk.bf16.mxu0 %vm537_vm4, %v3851_v10  ;;  %v2172_v7 = vshrl.u32 %v4628_v45, 16  ;;  %v2183_v10 = vshrl.u32 %v3267_v56, 16 }
  0x85   : > { %3760 = vmatprep.subr.msk.bf16.mxu0 %vm562_vm0, %v4619_v34  ;;  %v2164_v56 = vrot.slane %v2162_v12, 5  ;;  %v4686_v12 = vrot.slane %v2192_v8, 5  ;;  %v2198_v52 = vrot.slane %v2196_v58, 4  ;;  %v2152_v8 = vrot.slane %v2151_v46, 4 }
  0x86   : > { %v2156_v19 = vrot.slane %v2154_v49, 5  ;;  %v2178_v58 = vshll.u32 %v4676_v51, 16  ;;  %v2147_v46 = vsel %vm4180_vm3, %v2142_v26, %v4642_v1  ;;  %v2220_v49 = vshrl.u32 %v4698_v28, 16 }
  0x87   : > { %v2165_v35 = vor.u32 %v2164_v56, %v2161_v42  ;;  %v2231_v42 = vshrl.u32 %v3273_v15, 16  ;;  %v2234_v56 = vshll.u32 %v3273_v15, 16  ;;  %v5139_v15 = vcombine.low %v4543_v27, %v4558_v25  ;;  %v4738_v27 = vld [vmem:[%s4122_s11 + $0x58] sm:$0xf]  ;;  %v4741_v25 = vld [vmem:[%s4122_s11 + $0x44] sm:$0x1] }
  0x89   : > { %v2166_v24 = vrot.slane %v2165_v35, 4  ;;  %v2222_v35 = vrot.slane %v2220_v49, 4  ;;  %v2264_v49 = vshll.u32 %v4738_v27, 16 }
  0x8a   : > { %3554 = vmatmul.mubr.msk.bf16.gmra.mrb[4].mxu0 %vm537_vm4, %v3853_v30  ;;  %v2174_v30 = vrot.slane %v2172_v7, 4  ;;  %v2199_v7 = vor.u32 %v2198_v52, %v4686_v12 }
  0x8b   : > { %3472 = vmatmul.mubr.msk.bf16.gmra.mrb[12].mxu1 %vm537_vm4, %v3087_v47  ;;  %3557 = vmatprep.mubr.msk.bf16.mxu0 %vm537_vm4, %v3854_v41  ;;  %v2185_v47 = vrot.slane %v2183_v10, 4  ;;  %v3856_v41 = vld [vmem:[%s4122_s11 + $0x60] sm:$0xff]   ;;  %v3270_v10 = vld [vmem:[%s4122_s11 + $0x3c] sm:$0xf] }
  0x8c   : > { %3477 = vmatprep.mubr.msk.bf16.mxu1 %vm537_vm4, %v3105_v48  ;;  %v4690_v48 = vsel %vm4341_vm7, %v907_v59, %v908_v43  ;;  %v2175_v43 = vor.u32 %v2174_v30, %v4678_v0  ;;  %v4707_v59 = vld [vmem:[%s4122_s11 + $0x4c] sm:$0xf]  ;;  %v2207_v6 = vshrl.u32 %v3270_v10, 16  ;;  %v2210_v54 = vshll.u32 %v3270_v10, 16 }
  0x8d   : > { %v2189_v20 = vor.u32 %v2188_v55, %v2185_v47  ;;  %v2157_v30 = vsel %vm4180_vm3, %v2152_v8, %v2156_v19  ;;  %v2180_v47 = vrot.slane %v2178_v58, 5  ;;  %v2244_v1 = vshrl.u32 %v4707_v59, 16  ;;  %v3276_v55 = vld [vmem:[%s4122_s11 + $0x54] sm:$0xf] }
  0x8e   : > { %v2204_v19 = vrot.slane %v2202_v44, 5  ;;  %v2200_v52 = vrot.slane %v2199_v7, 4  ;;  %v2209_v26 = vrot.slane %v2207_v6, 4  ;;  %v2212_v10 = vrot.slane %v2210_v54, 5  ;;  %v4744_v54 = vld [vmem:[%s4122_s11 + $0x50] sm:$0x1] }
  0x8f   : > { %v4731_v8 = vrot.slane %v2216_v32, 5  ;;  %v2233_v58 = vrot.slane %v2231_v42, 4  ;;  %v2255_v7 = vshrl.u32 %v3276_v55, 16  ;;  %v3286_v6 = vcombine.low %v2147_v46, %v2157_v30 }
  0x90   : > { %v2246_v44 = vrot.slane %v2244_v1, 4  ;;  %v2258_v32 = vshll.u32 %v3276_v55, 16  ;;  %v2268_v42 = vshrl.u32 %v4738_v27, 16  ;;  %v2205_v30 = vsel %vm4180_vm3, %v2200_v52, %v2204_v19 }
  0x91   : > { %v2226_v1 = vshll.u32 %v4741_v25, 16 }
  0x92   : > { %3558 = vmatmul.mubr.msk.bf16.gmra.mrb[8].mxu0 %vm537_vm4, %v3855_v50  ;;  %v2240_v50 = vshll.u32 %v4707_v59, 16  ;;  %v2260_v19 = vrot.slane %v2258_v32, 5 }
  0x93   : > { %3478 = vmatmul.mubr.msk.bf16.vlgmr.msra.gmra.mrb[0].mxu1 %vm537_vm4, %v3106_v40  ;;  %3561 = vmatprep.mubr.msk.bf16.mxu0 %vm537_vm4, %v3856_v41  ;;  %v2176_v40 = vrot.slane %v2175_v43, 4  ;;  %v2190_v41 = vrot.slane %v2189_v20, 4  ;;  %v2236_v43 = vrot.slane %v2234_v56, 5  ;;  %v3279_v56 = vld [vmem:[%s4122_s11 + $0x60] sm:$0xf] }
  0x94   : > { %3494 = vmatpush3.bf16.msra.mxu1 %v1160_v39  ;;  %3481 = vmatprep.mubr.msk.bf16.mxu1 %vm537_vm4, %v5139_v15  ;;  %v3866_v39 = vld [vmem:[%s5115_s1 + $0x8] sm:$0x3]  ;;  %v4746_v20 = vrot.slane %v2240_v50, 5  ;;  %v2171_v15 = vsel %vm4180_vm3, %v2166_v24, %v4678_v0  ;;  %v2213_v50 = vor.u32 %v2212_v10, %v2209_v26  ;;  %v4763_v0 = vld [vmem:[%s4122_s11 + $0x64] sm:$0xf]  ;;  %v2250_v24 = vshll.u32 %v4744_v54, 16 }
  0x95   : > { %3756 = vmatprep.subr.msk.bf16.mxu1 %vm562_vm0, %v3866_v39  ;;  %v2181_v39 = vsel %vm4180_vm3, %v2176_v40, %v2180_v47  ;;  %v2195_v46 = vsel %vm4180_vm3, %v2190_v41, %v4686_v12  ;;  %v2223_v47 = vor.u32 %v2222_v35, %v4731_v8  ;;  %v2237_v55 = vor.u32 %v2236_v43, %v2233_v58  ;;  %v4779_v10 = vld [vmem:[%s4122_s11 + $0x5c] sm:$0x1] }
  0x96   : > { %v2257_v40 = vrot.slane %v2255_v7, 4  ;;  %v5140_v12 = vcombine.low %v4548_v63, %v4565_v60  ;;  %v2247_v41 = vor.u32 %v2246_v44, %v4746_v20  ;;  %v2279_v52 = vshrl.u32 %v3279_v56, 16 }
  0x97   : > { %v2282_v26 = vshll.u32 %v3279_v56, 16  ;;  %v4781_v35 = vrot.slane %v2264_v49, 5  ;;  %v2270_v63 = vrot.slane %v2268_v42, 4  ;;  %v2288_v60 = vshll.u32 %v4763_v0, 16 }
  0x98   : > { %v2292_v58 = vshrl.u32 %v4763_v0, 16  ;;  %v3287_v43 = vcombine.low %v2171_v15, %v2181_v39  ;;  %v2631_v7 = vsel %vm562_vm0, %v4619_v34, 0  ;;  %v2228_v44 = vrot.slane %v2226_v1, 5 }
  0x99   : > { %v2214_v32 = vrot.slane %v2213_v50, 4  ;;  %v2252_v56 = vrot.slane %v2250_v24, 5  ;;  %v2248_v49 = vrot.slane %v2247_v41, 4  ;;  %v2274_v42 = vshll.u32 %v4779_v10, 16  ;;  %v4799_v50 = vld [vmem:[%s4122_s11 + $0x68] sm:$0x1] }
  0x9a   : > { %3562 = vmatmul.mubr.msk.bf16.gmra.mrb[12].mxu0 %vm537_vm4, %v3857_v18  ;;  %v5141_v18 = vcombine.low %v4569_v37, %v4578_v13  ;;  %v2224_v37 = vrot.slane %v2223_v47, 4  ;;  %v2238_v13 = vrot.slane %v2237_v55, 4  ;;  %v2284_v38 = vrot.slane %v2282_v26, 5 }
  0x9b   : > { %3482 = vmatmul.mubr.msk.bf16.gmra.mrb[4].mxu1 %vm537_vm4, %v5140_v12  ;;  %3567 = vmatprep.mubr.msk.bf16.mxu0 %vm537_vm4, %v3286_v6  ;;  %v3288_v6 = vcombine.low %v2195_v46, %v2205_v30  ;;  %v3282_v12 = vld [vmem:[%s4122_s11 + $0x6c] sm:$0xf]  ;;  %v2261_v5 = vor.u32 %v2260_v19, %v2257_v40  ;;  %v2271_v15 = vor.u32 %v2270_v63, %v4781_v35  ;;  %v4793_v39 = vrot.slane %v2288_v60, 5 }
  0x9c   : > { %3485 = vmatprep.mubr.msk.bf16.mxu1 %vm537_vm4, %v5141_v18  ;;  %v2281_v18 = vrot.slane %v2279_v52, 4  ;;  %v2294_v34 = vrot.slane %v2292_v58, 4  ;;  %v1436_v46 = vor.u32 %v4692_v36, %v4680_v11  ;;  %v1439_v30 = vshll.u32 %v4457_v57, 16 }
  0x9d   : > { %v2303_v1 = vshrl.u32 %v3282_v12, 16  ;;  %v2306_v47 = vshll.u32 %v3282_v12, 16  ;;  %v2219_v55 = vsel %vm4180_vm3, %v2214_v32, %v4731_v8  ;;  %v2229_v24 = vsel %vm4180_vm3, %v2224_v37, %v2228_v44 }
  0x9e   : > { %v2312_v40 = vshll.u32 %v4790_v2, 16  ;;  %v2316_v41 = vshrl.u32 %v4790_v2, 16  ;;  %v5142_v57 = vcombine.low %v4590_v21, %v4607_v33  ;;  %v2243_v36 = vsel %vm4180_vm3, %v2238_v13, %v4746_v20 }
  0x9f   : > { %v2253_v8 = vsel %vm4180_vm3, %v2248_v49, %v2252_v56  ;;  %v2276_v19 = vrot.slane %v2274_v42, 5  ;;  %v2285_v52 = vor.u32 %v2284_v38, %v2281_v18  ;;  %v5143_v26 = vcombine.low %v4632_v9, %v4646_v29  ;;  %v3169_v18 = vld [vmem:[%s4122_s11 + $0x48] sm:$0xf] }
  0xa0   : > { %v2262_v21 = vrot.slane %v2261_v5, 4  ;;  %v2272_v33 = vrot.slane %v2271_v15, 4  ;;  %v2295_v63 = vor.u32 %v2294_v34, %v4793_v39  ;;  %v2298_v60 = vshll.u32 %v4799_v50, 16  ;;  %v3858_v5 = vld [vmem:[%s4122_s11 + $0xc] sm:$0xff]   ;;  %v3302_v34 = vld [vmem:[%s4122_s11 + $0x18] sm:$0xe] }
  0xa1   : > { %v2305_v20 = vrot.slane %v2303_v1, 4  ;;  %v2308_v58 = vrot.slane %v2306_v47, 5  ;;  %v4828_v38 = vrot.slane %v2312_v40, 5  ;;  %v2318_v9 = vrot.slane %v2316_v41, 4 }
  0xa2   : > { %3568 = vmatmul.mubr.msk.bf16.vlgmr.msra.gmra.mrb[0].mxu0 %vm537_vm4, %v3287_v43  ;;  %v3289_v43 = vcombine.low %v2219_v55, %v2229_v24  ;;  %v1437_v29 = vrot.slane %v1436_v46, 4  ;;  %v1441_v44 = vrot.slane %v1439_v30, 5  ;;  %v3290_v32 = vcombine.low %v2243_v36, %v2253_v8 }
  0xa3   : > { %3486 = vmatmul.mubr.msk.bf16.gmra.mrb[8].mxu1 %vm537_vm4, %v5142_v57  ;;  %3584 = vmatpush3.bf16.msra.mxu0 %v2631_v7  ;;  %v4826_v7 = vld [vmem:[%s4122_s11 + $0x74] sm:$0x1]  ;;  %v2267_v37 = vsel %vm4180_vm3, %v2262_v21, %v4781_v35  ;;  %v2277_v13 = vsel %vm4180_vm3, %v2272_v33, %v2276_v19  ;;  %v2296_v56 = vrot.slane %v2295_v63, 4  ;;  %v2300_v12 = vrot.slane %v2298_v60, 5  ;;  %v3859_v19 = vld [vmem:[%s4122_s11 + $0x18] sm:$0xff]  }
  0xa4   : > { %3489 = vmatprep.mubr.msk.bf16.mxu1 %vm537_vm4, %v5143_v26  ;;  %3571 = vmatprep.mubr.msk.bf16.mxu0 %vm537_vm4, %v3288_v6  ;;  %v2286_v6 = vrot.slane %v2285_v52, 4  ;;  %v2309_v49 = vor.u32 %v2308_v58, %v2305_v20  ;;  %v2322_v42 = vshll.u32 %v4826_v7, 16  ;;  %v2319_v15 = vor.u32 %v2318_v9, %v4828_v38  ;;  %v3860_v26 = vld [vmem:[%s4122_s11 + $0x24] sm:$0xff]   ;;  %v3166_v21 = vld [vmem:[%s4122_s11 + $0x3c] sm:$0xf] }
  0xa5   : > { %v2526_v46 = vrot.slane %v4595_v61, 5  ;;  %v5144_v30 = vcombine.low %v4671_v23, %v4690_v48  ;;  %v3291_v35 = vcombine.low %v2267_v37, %v2277_v13  ;;  %v2301_v61 = vsel %vm4180_vm3, %v2296_v56, %v2300_v12  ;;  %v3303_v20 = vld [vmem:[%s4122_s11 + $0x24] sm:$0xe]  ;;  %v3304_v9 = vld [vmem:[%s4122_s11 + $0x30] sm:$0xe] }
  0xa6   : > { %v2291_v1 = vsel %vm4180_vm3, %v2286_v6, %v4793_v39  ;;  %v1420_v47 = vshrl.u32 %v3169_v18, 16  ;;  %v1423_v55 = vshll.u32 %v3169_v18, 16  ;;  %v1442_v23 = vsel %vm4180_vm3, %v1437_v29, %v1441_v44  ;;  %v3861_v18 = vld [vmem:[%s4122_s11 + $0x30] sm:$0xff]  }
  0xa7   : > { %v2310_v48 = vrot.slane %v2309_v49, 4  ;;  %v2324_v24 = vrot.slane %v2322_v42, 5  ;;  %v3310_v40 = vrot.slane %v3302_v34, 9  ;;  %v2529_v41 = vrot.slane %v4653_v22, 5 }
  0xa8   : > { %v2320_v57 = vrot.slane %v2319_v15, 4  ;;  %v2528_v39 = vrot.slane %v2526_v46, 4  ;;  %v1422_v36 = vrot.slane %v1420_v47, 4  ;;  %v1425_v8 = vrot.slane %v1423_v55, 5  ;;  %v3172_v55 = vld [vmem:[%s4122_s11 + $0x54] sm:$0xf] }
  0xa9   : > { %v3292_v52 = vcombine.low %v2291_v1, %v2301_v61  ;;  %v2315_v63 = vsel %vm4180_vm3, %v2310_v48, %v4828_v38  ;;  %v2527_v60 = vsel %vm4341_vm7, %v3310_v40, %v2526_v46  ;;  %v2533_v22 = vrot.slane %v4628_v45, 5  ;;  %v3305_v1 = vld [vmem:[%s4122_s11 + $0x3c] sm:$0xe]  ;;  %v3306_v40 = vld [vmem:[%s4122_s11 + $0x48] sm:$0xe] }
  0xaa   : > { %3572 = vmatmul.mubr.msk.bf16.gmra.mrb[4].mxu0 %vm537_vm4, %v3289_v43  ;;  %v1426_v33 = vor.u32 %v1425_v8, %v1422_v36  ;;  %v2325_v58 = vsel %vm4180_vm3, %v2320_v57, %v2324_v24  ;;  %v2530_v43 = vsel %vm4341_vm7, %v2528_v39, %v2529_v41  ;;  %v2540_v29 = vrot.slane %v4649_v14, 5 }
  0xab   : > { %3490 = vmatmul.mubr.msk.bf16.gmra.mrb[12].mxu1 %vm537_vm4, %v5144_v30  ;;  %3575 = vmatprep.mubr.msk.bf16.mxu0 %vm537_vm4, %v3290_v32  ;;  %v1396_v38 = vshrl.u32 %v3166_v21, 16  ;;  %v1399_v32 = vshll.u32 %v3166_v21, 16  ;;  %v1405_v45 = vshll.u32 %v4422_v53, 16  ;;  %v1409_v6 = vshrl.u32 %v4422_v53, 16  ;;  %v3862_v30 = vld [vmem:[%s4122_s11 + $0x3c] sm:$0xff]  }
  0xac   : > { %3495 = vmatprep.mubr.msk.bf16.mxu1 %vm537_vm4, %v3858_v5  ;;  %v1427_v44 = vrot.slane %v1426_v33, 4  ;;  %v3311_v5 = vrot.slane %v3303_v20, 9  ;;  %v2535_v37 = vrot.slane %v2533_v22, 4  ;;  %v2536_v13 = vrot.slane %v4676_v51, 5 }
  0xad   : > { %v3312_v56 = vrot.slane %v3304_v9, 9  ;;  %v3293_v49 = vcombine.low %v2315_v63, %v2325_v58  ;;  %v3319_v42 = vcombine.low %v2527_v60, %v2530_v43  ;;  %v2542_v53 = vrot.slane %v2540_v29, 4  ;;  %v3863_v63 = vld [vmem:[%s4122_s11 + $0x48] sm:$0xff]   ;;  %v3864_v58 = vld [vmem:[%s4122_s11 + $0x54] sm:$0xff]  }
  0xae   : > { %v1432_v14 = vsel %vm4180_vm3, %v1427_v44, %v4680_v11  ;;  %v1398_v15 = vrot.slane %v1396_v38, 4  ;;  %v1401_v34 = vrot.slane %v1399_v32, 5  ;;  %v4887_v46 = vrot.slane %v1405_v45, 5  ;;  %v3175_v44 = vld [vmem:[%s4122_s11 + $0x60] sm:$0xf] }
  0xaf   : > { %v4883_v12 = vcombine.low %v1432_v14, %v1442_v23  ;;  %v1411_v11 = vrot.slane %v1409_v6, 4  ;;  %v2534_v51 = vsel %vm4341_vm7, %v3311_v5, %v2533_v22  ;;  %v2547_v61 = vrot.slane %v4698_v28, 5  ;;  %v3307_v14 = vld [vmem:[%s4122_s11 + $0x54] sm:$0xe] }
  0xb0   : > { %v1415_v47 = vshll.u32 %v4436_v17, 16  ;;  %v1402_v48 = vor.u32 %v1401_v34, %v1398_v15  ;;  %v2554_v41 = vrot.slane %v4707_v59, 5  ;;  %v3313_v17 = vrot.slane %v3305_v1, 9  ;;  %v5146_v34 = vld [vmem:[#allocation12_spill] sm:$0xff] }
  0xb1   : > { %v1412_v24 = vor.u32 %v1411_v11, %v4887_v46  ;;  %v2550_v57 = vrot.slane %v4741_v25, 5  ;;  %v1444_v39 = vshrl.u32 %v3172_v55, 16  ;;  %v1447_v36 = vshll.u32 %v3172_v55, 16 }
  0xb2   : > { %3576 = vmatmul.mubr.msk.bf16.gmra.mrb[8].mxu0 %vm537_vm4, %v3291_v35  ;;  %v2537_v35 = vsel %vm4341_vm7, %v2535_v37, %v2536_v13  ;;  %v1453_v8 = vshll.u32 %v4467_v62, 16  ;;  %v1417_v21 = vrot.slane %v1415_v47, 5  ;;  %v3314_v33 = vrot.slane %v3306_v40, 9 }
  0xb3   : > { %3496 = vmatmul.mubr.msk.bf16.vlgmr.msra.gmra.mrb[0].mxu1 %vm537_vm4, %v3859_v19  ;;  %3579 = vmatprep.mubr.msk.bf16.mxu0 %vm537_vm4, %v3292_v52  ;;  %v3320_v28 = vcombine.low %v2534_v51, %v2537_v35  ;;  %v1457_v19 = vshrl.u32 %v4467_v62, 16  ;;  %v1403_v59 = vrot.slane %v1402_v48, 4  ;;  %v1413_v60 = vrot.slane %v1412_v24, 4 }
  0xb4   : > { %3622 = vmatpush3.bf16.msra.mxu1 %v4137_v4  ;;  %3499 = vmatprep.mubr.msk.bf16.mxu1 %vm537_vm4, %v3860_v26  ;;  %v2543_v4 = vrot.slane %v4684_v3, 5  ;;  %v2541_v3 = vsel %vm4341_vm7, %v3312_v56, %v2540_v29  ;;  %v2549_v26 = vrot.slane %v2547_v61, 4  ;;  %v2556_v20 = vrot.slane %v2554_v41, 4 }
  0xb5   : > { %v2557_v22 = vrot.slane %v4744_v54, 5  ;;  %v1446_v25 = vrot.slane %v1444_v39, 4  ;;  %v1449_v43 = vrot.slane %v1447_v36, 5  ;;  %v1455_v9 = vrot.slane %v1453_v8, 5 }
  0xb6   : > { %v2544_v23 = vsel %vm4341_vm7, %v2542_v53, %v2543_v4  ;;  %v1459_v29 = vrot.slane %v1457_v19, 4  ;;  %v2548_v62 = vsel %vm4341_vm7, %v3313_v17, %v2547_v61  ;;  %v2551_v38 = vsel %vm4341_vm7, %v2549_v26, %v2550_v57  ;;  %v5147_v19 = vld [vmem:[#allocation14_spill] sm:$0xff]  ;;  %v3309_v26 = vld [vmem:[%s4122_s11 + $0x6c] sm:$0xe] }
  0xb7   : > { %v3321_v52 = vcombine.low %v2541_v3, %v2544_v23  ;;  %v2555_v32 = vsel %vm4341_vm7, %v3314_v33, %v2554_v41  ;;  %v2561_v54 = vrot.slane %v4738_v27, 5  ;;  %v1408_v45 = vsel %vm4180_vm3, %v1403_v59, %v4887_v46  ;;  %v3308_v27 = vld [vmem:[%s4122_s11 + $0x60] sm:$0xe] }
  0xb8   : > { %v1418_v6 = vsel %vm4180_vm3, %v1413_v60, %v1417_v21  ;;  %v2558_v5 = vsel %vm4341_vm7, %v2556_v20, %v2557_v22  ;;  %v2568_v37 = vrot.slane %v4763_v0, 5  ;;  %v1468_v13 = vshrl.u32 %v3175_v44, 16  ;;  %v3865_v0 = vld [vmem:[%s4122_s11 + $0x60] sm:$0xff]  }
  0xb9   : > { %v1471_v56 = vshll.u32 %v3175_v44, 16  ;;  %v3322_v4 = vcombine.low %v2548_v62, %v2551_v38  ;;  %v1460_v15 = vor.u32 %v1459_v29, %v1455_v9  ;;  %v1463_v46 = vshll.u32 %v5146_v34, 16 }
  0xba   : > { %3580 = vmatmul.mubr.msk.bf16.gmra.mrb[12].mxu0 %vm537_vm4, %v3293_v49  ;;  %v5145_v49 = vld [vmem:[#allocation13_spill] sm:$0xff]  ;;  %v3183_v11 = vcombine.low %v1408_v45, %v1418_v6  ;;  %v3315_v51 = vrot.slane %v3307_v14, 9  ;;  %v2564_v35 = vrot.slane %v4779_v10, 5  ;;  %v2563_v1 = vrot.slane %v2561_v54, 4 }
  0xbb   : > { %3500 = vmatmul.mubr.msk.bf16.gmra.mrb[4].mxu1 %vm537_vm4, %v3861_v18  ;;  %3585 = vmatprep.mubr.msk.bf16.mxu0 %vm537_vm4, %v3319_v42  ;;  %v1477_v42 = vshll.u32 %v5145_v49, 16  ;;  %v1481_v53 = vshrl.u32 %v5145_v49, 16  ;;  %v1450_v18 = vor.u32 %v1449_v43, %v1446_v25  ;;  %v3316_v3 = vrot.slane %v3308_v27, 9 }
  0xbc   : > { %3503 = vmatprep.mubr.msk.bf16.mxu1 %vm537_vm4, %v3862_v30  ;;  %v3323_v30 = vcombine.low %v2555_v32, %v2558_v5  ;;  %v2570_v61 = vrot.slane %v2568_v37, 4  ;;  %v2571_v47 = vrot.slane %v4799_v50, 5  ;;  %v1470_v55 = vrot.slane %v1468_v13, 4 }
  0xbd   : > { %v1473_v23 = vrot.slane %v1471_v56, 5  ;;  %v1479_v48 = vrot.slane %v1477_v42, 5  ;;  %v1483_v24 = vrot.slane %v1481_v53, 4  ;;  %v1451_v40 = vrot.slane %v1450_v18, 4 }
  0xbe   : > { %v1461_v41 = vrot.slane %v1460_v15, 4  ;;  %v2562_v10 = vsel %vm4341_vm7, %v3315_v51, %v2561_v54  ;;  %v2565_v50 = vsel %vm4341_vm7, %v2563_v1, %v2564_v35  ;;  %v2569_v17 = vsel %vm4341_vm7, %v3316_v3, %v2568_v37 }
  0xbf   : > { %v2575_v57 = vrot.slane %v4790_v2, 5  ;;  %v2572_v39 = vsel %vm4341_vm7, %v2570_v61, %v2571_v47  ;;  %v1474_v36 = vor.u32 %v1473_v23, %v1470_v55  ;;  %v1484_v8 = vor.u32 %v1483_v24, %v1479_v48 }
  0xc0   : > { %v1456_v21 = vsel %vm4180_vm3, %v1451_v40, %v1455_v9  ;;  %v3325_v59 = vcombine.low %v2569_v17, %v2572_v39  ;;  %v3317_v60 = vrot.slane %v3309_v26, 9  ;;  %v2578_v20 = vrot.slane %v4826_v7, 5 }
  0xc1   : > { %v2577_v2 = vrot.slane %v2575_v57, 4  ;;  %v1485_v25 = vrot.slane %v1484_v8, 4 }
  0xc2   : > { %3586 = vmatmul.mubr.msk.bf16.vlgmr.msra.gmra.mrb[0].mxu0 %vm537_vm4, %v3320_v28  ;;  %v1465_v28 = vrot.slane %v1463_v46, 5  ;;  %v2576_v9 = vsel %vm4341_vm7, %v3317_v60, %v2575_v57 }
  0xc3   : > { %3504 = vmatmul.mubr.msk.bf16.gmra.mrb[8].mxu1 %vm537_vm4, %v3863_v63  ;;  %3589 = vmatprep.mubr.msk.bf16.mxu0 %vm537_vm4, %v3321_v52  ;;  %v1487_v52 = vshll.u32 %v5147_v19, 16  ;;  %v3324_v63 = vcombine.low %v2562_v10, %v2565_v50  ;;  %v2579_v29 = vsel %vm4341_vm7, %v2577_v2, %v2578_v20 }
  0xc4   : > { %3507 = vmatprep.mubr.msk.bf16.mxu1 %vm537_vm4, %v3864_v58  ;;  %v1466_v33 = vsel %vm4180_vm3, %v1461_v41, %v1465_v28  ;;  %v1475_v58 = vrot.slane %v1474_v36, 4  ;;  %v3326_v62 = vcombine.low %v2576_v9, %v2579_v29 }
  0xc5   : > { %v3185_v22 = vcombine.low %v1456_v21, %v1466_v33  ;;  %v1489_v43 = vrot.slane %v1487_v52, 5 }
  0xc6   : > { %v1480_v7 = vsel %vm4180_vm3, %v1475_v58, %v1479_v48 }
  0xc7   : > { %v1490_v44 = vsel %vm4180_vm3, %v1485_v25, %v1489_v43 }
  0xc8   : > { %v3186_v38 = vcombine.low %v1480_v7, %v1490_v44 }
  0xca   : > { %3590 = vmatmul.mubr.msk.bf16.gmra.mrb[4].mxu0 %vm537_vm4, %v3322_v4 }
  0xcb   : > { %3508 = vmatmul.mubr.msk.bf16.gmra.mrb[12].mxu1 %vm537_vm4, %v3865_v0  ;;  %3593 = vmatprep.mubr.msk.bf16.mxu0 %vm537_vm4, %v3323_v30 }
  0xcc   : > { %3521 = vmatprep.mubr.msk.bf16.mxu1 %vm537_vm4, %v3183_v11 }
  0xd2   : > { %3594 = vmatmul.mubr.msk.bf16.gmra.mrb[8].mxu0 %vm537_vm4, %v3324_v63 }
  0xd3   : > { %3522 = vmatmul.mubr.msk.bf16.vlgmr.msra.gmra.mrb[8].mxu1 %vm537_vm4, %v4883_v12  ;;  %3597 = vmatprep.mubr.msk.bf16.mxu0 %vm537_vm4, %v3325_v59 }
  0xd4   : > { %3525 = vmatprep.mubr.msk.bf16.mxu1 %vm537_vm4, %v3185_v22 }
  0xda   : > { %3598 = vmatmul.mubr.msk.bf16.gmra.mrb[12].mxu0 %vm537_vm4, %v3326_v62 }
  0xdb   : > { %3526 = vmatmul.mubr.msk.bf16.gmra.mrb[12].mxu1 %vm537_vm4, %v3186_v38 }
 0x186   : > { %v3497_v12 = vpop.f32.mrb[0].mxu1 }
 0x187   : > { %v1196_v32 = vpop.f32.mrb[1].mxu1 }
 0x188   : > { %v3498_v54 = vpop.f32.mrb[2].mxu1 }
 0x189   : > { %v1199_v45 = vpop.f32.mrb[3].mxu1 }
 0x18e   : > { %v3501_v16 = vpop.f32.mrb[4].mxu1 }
 0x18f   : > { %v1212_v6 = vpop.f32.mrb[5].mxu1 }
 0x190   : > { %v3502_v5 = vpop.f32.mrb[6].mxu1 }
 0x191   : > { %v1215_v14 = vpop.f32.mrb[7].mxu1 }
 0x195   : > { %v3587_v37 = vpop.f32.mrb[0].mxu0 }
 0x196   : > { %v3623_v27 = vadd.f32 %v3587_v37, %v3497_v12  ;;  %v2667_v13 = vpop.f32.mrb[1].mxu0 }
 0x197   : > { %v3624_v56 = vadd.f32 %v2667_v13, %v1196_v32  ;;  %v3588_v49 = vpop.f32.mrb[2].mxu0 }
 0x198   : > { %v3625_v42 = vadd.f32 %v3588_v49, %v3498_v54  ;;  %v2670_v53 = vpop.f32.mrb[3].mxu0  ;;  %v2755_v15 = vadd.f32 %v3623_v27, %v4981_v31 }
 0x199   : > { %v2753_v4 = vadd.f32 %v3624_v56, %v4981_v31  ;;  %v3626_v18 = vadd.f32 %v2670_v53, %v1199_v45 }
 0x19a   : > { %v2756_v11 = vadd.f32 %v3625_v42, %v4981_v31  ;;  %v2771_v1 = vmax.f32 %v2755_v15, 0.0 }
 0x19b   : > { %v2754_v34 = vadd.f32 %v3626_v18, %v4981_v31  ;;  %v2769_v46 = vmax.f32 %v2753_v4, 0.0 }
 0x19c   : > { %v2772_v48 = vmax.f32 %v2756_v11, 0.0 }
 0x19d   : > { %v2770_v30 = vmax.f32 %v2754_v34, 0.0  ;;  %v3591_v51 = vpop.f32.mrb[4].mxu0 }
 0x19e   : > { %v3627_v35 = vadd.f32 %v3591_v51, %v3501_v16  ;;  %v2683_v0 = vpop.f32.mrb[5].mxu0 }
 0x19f   : > { %v2786_v3 = vadd.f32 %v2770_v30, %v2769_v46  ;;  %v3628_v61 = vadd.f32 %v2683_v0, %v1212_v6  ;;  %v3592_v47 = vpop.f32.mrb[6].mxu0 }
 0x1a0   : > { %v3629_v55 = vadd.f32 %v3592_v47, %v3502_v5  ;;  %v2686_v23 = vpop.f32.mrb[7].mxu0  ;;  %v2759_v28 = vadd.f32 %v3627_v35, %v4981_v31 }
 0x1a1   : > { %v2787_v24 = vadd.f32 %v2786_v3, %v2771_v1  ;;  %v2757_v40 = vadd.f32 %v3628_v61, %v4981_v31  ;;  %v3630_v41 = vadd.f32 %v2686_v23, %v1215_v14 }
 0x1a2   : > { %v2760_v39 = vadd.f32 %v3629_v55, %v4981_v31  ;;  %v2775_v26 = vmax.f32 %v2759_v28, 0.0 }
 0x1a3   : > { %v2773_v10 = vmax.f32 %v2757_v40, 0.0  ;;  %v2788_v50 = vadd.f32 %v2787_v24, %v2772_v48  ;;  %v2758_v17 = vadd.f32 %v3630_v41, %v4981_v31 }
 0x1a4   : > { %v2776_v22 = vmax.f32 %v2760_v39, 0.0  ;;  %v4004_v39 = vmov (!%p3336_p1), 0.0  }
 0x1a5   : > { %v2789_v57 = vadd.f32 %v2788_v50, %v2773_v10  ;;  %v2774_v36 = vmax.f32 %v2758_v17, 0.0  ;;  %v3595_v8 = vpop.f32.mrb[8].mxu0  ;;  %v2785_v50 = vld [vmem:[#allocation2] sm:$0x1]  ;;  %3601 = vmatprep.subr.bf16.mxu0 (!%p3336_p1), %v4004_v39  ;;  %3617 = vmatprep.mubr.msk.bf16.mxu0 (!%p3336_p1), %vm4005_vm8, %v4004_v39 }
 0x1a6   : > { %v3523_v19 = vpop.f32.mrb[8].mxu1  ;;  %v2699_v52 = vpop.f32.mrb[9].mxu0 }
 0x1a7   : > { %v2790_v21 = vadd.f32 %v2789_v57, %v2774_v36  ;;  %v3631_v33 = vadd.f32 %v3595_v8, %v3523_v19  ;;  %v1610_v63 = vpop.f32.mrb[9].mxu1  ;;  %v3596_v59 = vpop.f32.mrb[10].mxu0  ;;  %v3868_v36 = vld [vmem:[%s5117_s3 + $0x8] sm:$0xff] (!%p3336_p1)   ;;  %v3869_v8 = vld [vmem:[%s5117_s3 + $0x10] sm:$0xff] (!%p3336_p1)  }
 0x1a8   : > { %v3632_v60 = vadd.f32 %v2699_v52, %v1610_v63  ;;  %v3524_v2 = vpop.f32.mrb[10].mxu1  ;;  %v2702_v20 = vpop.f32.mrb[11].mxu0  ;;  %v3873_v63 = vld [vmem:[%s5117_s3 + $0x30] sm:$0xff] (!%p3336_p1)  }
 0x1a9   : > { %v2791_v58 = vadd.f32 %v2790_v21, %v2775_v26  ;;  %v3633_v25 = vadd.f32 %v3596_v59, %v3524_v2  ;;  %v1613_v43 = vpop.f32.mrb[11].mxu1  ;;  %v2763_v44 = vadd.f32 %v3631_v33, %v4981_v31  ;;  %v3870_v26 = vld [vmem:[%s5117_s3 + $0x18] sm:$0xff] (!%p3336_p1)   ;;  %v3871_v21 = vld [vmem:[%s5117_s3 + $0x20] sm:$0xff] (!%p3336_p1)   ;;  %v3872_v33 = vld [vmem:[%s5117_s3 + $0x28] sm:$0xff] (!%p3336_p1)  }
 0x1aa   : > { %v2761_v9 = vadd.f32 %v3632_v60, %v4981_v31  ;;  %v3634_v29 = vadd.f32 %v2702_v20, %v1613_v43  ;;  %v3874_v59 = vld [vmem:[%s5117_s3 + $0x38] sm:$0xff] (!%p3336_p1)   ;;  %v2833_v2 = vld [vmem:[%s5118_s4] sm:$0x1] (!%p3336_p1) }
 0x1ab   : > { %v2792_v7 = vadd.f32 %v2791_v58, %v2776_v22  ;;  %v2764_v54 = vadd.f32 %v3633_v25, %v4981_v31  ;;  %v2779_v27 = vmax.f32 %v2763_v44, 0.0 }
 0x1ac   : > { %v2777_v62 = vmax.f32 %v2761_v9, 0.0  ;;  %v2762_v38 = vadd.f32 %v3634_v29, %v4981_v31 }
 0x1ad   : > { %v3599_v12 = vpop.f32.mrb[12].mxu0  ;;  %v2780_v18 = vmax.f32 %v2764_v54, 0.0 }
 0x1ae   : > { %v2793_v32 = vadd.f32 %v2792_v7, %v2777_v62  ;;  %v2778_v45 = vmax.f32 %v2762_v38, 0.0  ;;  %v3527_v16 = vpop.f32.mrb[12].mxu1  ;;  %v2715_v6 = vpop.f32.mrb[13].mxu0 }
 0x1af   : > { %v3635_v5 = vadd.f32 %v3599_v12, %v3527_v16  ;;  %v1626_v14 = vpop.f32.mrb[13].mxu1  ;;  %v3600_v37 = vpop.f32.mrb[14].mxu0 }
 0x1b0   : > { %v2794_v13 = vadd.f32 %v2793_v32, %v2778_v45  ;;  %v3636_v56 = vadd.f32 %v2715_v6, %v1626_v14  ;;  %v3528_v49 = vpop.f32.mrb[14].mxu1  ;;  %v2718_v42 = vpop.f32.mrb[15].mxu0 }
 0x1b1   : > { %v3637_v53 = vadd.f32 %v3600_v37, %v3528_v49  ;;  %v1629_v4 = vpop.f32.mrb[15].mxu1  ;;  %v2767_v11 = vadd.f32 %v3635_v5, %v4981_v31 }
 0x1b2   : > { %v2795_v15 = vadd.f32 %v2794_v13, %v2779_v27  ;;  %v2765_v34 = vadd.f32 %v3636_v56, %v4981_v31  ;;  %v3638_v46 = vadd.f32 %v2718_v42, %v1629_v4 }
 0x1b3   : > { %v2768_v1 = vadd.f32 %v3637_v53, %v4981_v31  ;;  %v2783_v61 = vmax.f32 %v2767_v11, 0.0 }
 0x1b4   : > { %v2781_v30 = vmax.f32 %v2765_v34, 0.0  ;;  %v2796_v51 = vadd.f32 %v2795_v15, %v2780_v18  ;;  %v2766_v35 = vadd.f32 %v3638_v46, %v4981_v31  ;;  %v3867_v31 = vld [vmem:[%s5117_s3] sm:$0xff] (!%p3336_p1)  }
 0x1b5   : > { %v2784_v55 = vmax.f32 %v2768_v1, 0.0  ;;  %3602 = vmatpush3.bf16.msra.mxu0 (!%p3336_p1), %v3867_v31 }
 0x1b6   : > { %v2797_v0 = vadd.f32 %v2796_v51, %v2781_v30  ;;  %v2782_v3 = vmax.f32 %v2766_v35, 0.0  ;;  %3603 = vmatprep.subr.bf16.mxu0 (!%p3336_p1), %v4004_v39 }
 0x1b8   : > { %v2798_v47 = vadd.f32 %v2797_v0, %v2782_v3 }
 0x1b9   : > { %3604 = vmatpush3.bf16.msra.mxu0 (!%p3336_p1), %v3868_v36 }
 0x1ba   : > { %v2799_v23 = vadd.f32 %v2798_v47, %v2783_v61  ;;  %3605 = vmatprep.subr.bf16.mxu0 (!%p3336_p1), %v4004_v39 }
 0x1bc   : > { %v2800_v48 = vadd.f32 %v2799_v23, %v2784_v55 }
 0x1bd   : > { %3606 = vmatpush3.bf16.msra.mxu0 (!%p3336_p1), %v3869_v8 }
 0x1be   : > { %v2801_v24 = vrot.slane %v2800_v48, 4  ;;  %3607 = vmatprep.subr.bf16.mxu0 (!%p3336_p1), %v4004_v39 }
 0x1c0   : > { %v2802_v40 = vadd.f32 %v2801_v24, %v2800_v48 }
 0x1c1   : > { %3608 = vmatpush3.bf16.msra.mxu0 (!%p3336_p1), %v3870_v26 }
 0x1c2   : > { %v2803_v41 = vrot.slane %v2802_v40, 2  ;;  %3609 = vmatprep.subr.bf16.mxu0 (!%p3336_p1), %v4004_v39 }
 0x1c4   : > { %v2804_v28 = vadd.f32 %v2803_v41, %v2802_v40 }
 0x1c5   : > { %3610 = vmatpush3.bf16.msra.mxu0 (!%p3336_p1), %v3871_v21 }
 0x1c6   : > { %v2805_v10 = vrot.slane %v2804_v28, 1  ;;  %2812 = sbr.rel (%p3336_p1) target bundleno = 687 (0x2af), region = 48  ;;  %3611 = vmatprep.subr.bf16.mxu0 (!%p3336_p1), %v4004_v39 }
 0x1c8   : > { %v2806_v17 = vadd.f32 %v2805_v10, %v2804_v28 }
 0x1c9   : > { %3612 = vmatpush3.bf16.msra.mxu0 (!%p3336_p1), %v3872_v33 }
 0x1ca   : > { %v2807_v57 = vadd.f32 %v2806_v17, %v2785_v50  ;;  %3613 = vmatprep.subr.bf16.mxu0 (!%p3336_p1), %v4004_v39 }
 0x1cc   : > { %2808 = vst [vmem:[#allocation2] sm:$0x1] %v2807_v57 }
 0x1cd   : > { %3614 = vmatpush3.bf16.msra.mxu0 %v3873_v63 }
 0x1ce   : > { %3615 = vmatprep.subr.bf16.mxu0 %v4004_v39 }
 0x1d1   : > { %3616 = vmatpush3.bf16.msra.mxu0 %v3874_v59 }
 0x1d3   : > { %v2813_v19 = vld [vmem:[#allocation2] sm:$0x1] }
 0x1d4   : > { %v2814_v52 = vmul.f32 0.00390625, %v2813_v19 }
 0x1d6   : > { %2815 = vst [vmem:[%s275_s8] sm:$0x1] %v2814_v52  ;;  %v2816_v60 = vpack.c.bf16 %v2814_v52, %v2814_v52 }
 0x1d8   : > { %3618 = vmatmul.mubr.bf16.vlgmr.msra.gmra.mrb[0].mxu0 %v2816_v60 }
 0x2ab   : > { %v2916_v20 = vpop.f32.mrb[0].mxu0 }
 0x2ac   : > { %v2917_v22 = vadd.f32 %v2916_v20, %v2833_v2  ;;  %v3619_v58 = vpop.f32.mrb[1].mxu0 }
 0x2ad   : > { %v2919_v25 = vpop.f32.mrb[2].mxu0 }
 0x2ae   : > { %2922 = vst [vmem:[%s269_s12] sm:$0x1] %v2917_v22  ;;  %v3620_v43 = vpop.f32.mrb[3].mxu0 }
 0x2af PF: > { %s3345_s24 = sshll.u32 %s3989_s25, 4  ;;  %s2940_s11 = sshll.u32 %s269_s12, 4  ;;  %s2941_s11 = int_to_ptr.vmem [resolvable:$true] %s2940_s11 }
 0x2b0   : > { %s5037_s20 = scalar_lea.hbm %s5119_s5, %s3345_s24  ;;  %s2924_s29 = scalar_lea.sflag [#allocation4], %s4113_s14 }
 0x2b1   : > { %s3875_s30 = scalar_lea.vmem %s2941_s11, 16  ;;  %s4006_s15 = smov [#allocation3]  }
 0x2b2   : > { %p3876_p2 = scmp.ne.s32.totalorder %s2941_s11, %s3875_s30  ;;  %s3879_s16 = sshll.u32 %s4006_s15, 4  ;;  %s3880_s16 = int_to_ptr.vmem [resolvable:$false] %s3879_s16 }
 0x2b3   : > { %s3881_s27 = scalar_lea.vmem %s3880_s16, 32  ;;  %p3882_p6 = scmp.lt.s32.totalorder %s2941_s11, %s3880_s16 }
 0x2b4   : > { %p3877_p4 = pnand %p3876_p2, %p4092_p3  ;;  %p3883_p7 = scmp.lt.s32.totalorder %s3881_s27, %s3875_s30 }
 0x2b6   : > { %p3878_p5 = pneg %p3877_p4  ;;  %p3884_p8 = por %p3883_p7, %p3882_p6 }
 0x2b8   : > { %p3885_p10 = pnand %p3884_p8, %p3878_p5 }
 0x2ba   : > { %3888 = shalt.err (!%p3885_p10)
}
 0x2bb   : > { %s3889_s12 = scalar_lea.hbm %s5037_s20, 16  ;;  %s3893_s18 = scalar_lea.hbm %s5119_s5, 32 }
 0x2bc   : > { %p3890_p11 = scmp.ne.s32.totalorder %s5037_s20, %s3889_s12  ;;  %p3894_p0 = scmp.lt.u32.totalorder %s5037_s20, %s5119_s5 }
 0x2bd   : > { %p3895_p1 = scmp.lt.u32.totalorder %s3893_s18, %s3889_s12  ;;  %p3897_p4 = scmp.lt.u32.totalorder %s3889_s12, %s5037_s20 }
 0x2be   : > { %p3891_p12 = pnand %p3890_p11, %p4092_p3 }
 0x2bf   : > { %p3896_p2 = por %p3895_p1, %p3894_p0 }
 0x2c0   : > { %p3892_p13 = pneg %p3891_p12 }
 0x2c1   : > { %p3898_p5 = por %p3897_p4, %p3896_p2 }
 0x2c3   : > { %p3899_p6 = pnand %p3898_p5, %p3892_p13 }
 0x2c5   : > { %3902 = shalt.err (!%p3899_p6)
}
 0x2c6   : > { %3763 = dma.vmem_to_hbm [thread:$0]  (%p4092_p3), %s2941_s11, 16, %s5037_s20, %s2924_s29  }
 0x2c7   : > { %s5064_s27 = scalar_lea.hbm %s5120_s6, %s3345_s24  ;;  %s2953_s7 = sshll.u32 %s275_s8, 4  ;;  %s2954_s7 = int_to_ptr.vmem [resolvable:$true] %s2953_s7 }
 0x2c8   : > { %s2928_s12 = scalar_lea.sflag [#allocation6], %s4113_s14  ;;  %s3903_s17 = scalar_lea.vmem %s2954_s7, 16 }
 0x2c9   : > { %p3904_p7 = scmp.ne.s32.totalorder %s2954_s7, %s3903_s17  ;;  %s4007_s18 = smov [#allocation5]  }
 0x2ca   : > { %s3907_s19 = sshll.u32 %s4007_s18, 4  ;;  %s3908_s19 = int_to_ptr.vmem [resolvable:$false] %s3907_s19 }
 0x2cb   : > { %p3905_p8 = pnand %p3904_p7, %p4092_p3  ;;  %s3909_s15 = scalar_lea.vmem %s3908_s19, 32 }
 0x2cc   : > { %p3910_p11 = scmp.lt.s32.totalorder %s2954_s7, %s3908_s19  ;;  %p3911_p12 = scmp.lt.s32.totalorder %s3909_s15, %s3903_s17 }
 0x2cd   : > { %p3906_p10 = pneg %p3905_p8 }
 0x2ce   : > { %p3912_p13 = por %p3911_p12, %p3910_p11 }
 0x2d0   : > { %p3913_p0 = pnand %p3912_p13, %p3906_p10 }
 0x2d2   : > { %3916 = shalt.err (!%p3913_p0)
}
 0x2d3   : > { %s3917_s25 = scalar_lea.hbm %s5064_s27, 16  ;;  %s3921_s24 = scalar_lea.hbm %s5120_s6, 32 }
 0x2d4   : > { %p3918_p1 = scmp.ne.s32.totalorder %s5064_s27, %s3917_s25  ;;  %p3922_p5 = scmp.lt.u32.totalorder %s5064_s27, %s5120_s6 }
 0x2d5   : > { %p3923_p6 = scmp.lt.u32.totalorder %s3921_s24, %s3917_s25  ;;  %p3925_p8 = scmp.lt.u32.totalorder %s3917_s25, %s5064_s27 }
 0x2d6   : > { %p3919_p2 = pnand %p3918_p1, %p4092_p3 }
 0x2d7   : > { %p3924_p7 = por %p3923_p6, %p3922_p5 }
 0x2d8   : > { %p3920_p4 = pneg %p3919_p2 }
 0x2d9   : > { %p3926_p10 = por %p3925_p8, %p3924_p7 }
 0x2db   : > { %p3927_p11 = pnand %p3926_p10, %p3920_p4 }
 0x2dd   : > { %3930 = shalt.err (!%p3927_p11)
}
 0x2de   : > { %3764 = dma.vmem_to_hbm [thread:$0]  (%p4092_p3), %s2954_s7, 16, %s5064_s27, %s2928_s12  }
 0x2df PF: > { %p3774_p12 = scmp.ge.s32.totalorder %s4001_s28, 2  ;;  %s2965_s29 = sand.u32 1, %s3973_s21  }
 0x2e0   : > { %s2966_s30 = scalar_lea.sflag [#allocation4], %s2965_s29 }
 0x2e1   : > { %p3768_p13 = pnand %p3774_p12, %p4102_p9 }
 0x2e3   : > { %3964 = dma.done.wait (!%p3768_p13), %s2966_s30, 16  }
 0x2e4   : > { %3966 = vsyncadd (!%p3768_p13), %s2966_s30, 4294967280  ;;  %s2974_s16 = scalar_lea.sflag [#allocation6], %s2965_s29 }
 0x2e5   : > { %3968 = dma.done.wait (!%p3768_p13), %s2974_s16, 16  }
 0x2e6   : > { %3970 = vsyncadd (!%p3768_p13), %s2974_s16, 4294967280  ;;  %s23_s28 = sadd.s32 1, %s4001_s28   ;;  %s5148_s25 = sld [smem:[#allocation9_spill]] }
 0x2e7   : > { %p20_p0 = scmp.ge.s32.totalorder %s23_s28, 6   ;;  %s5149_s9 = sld [smem:[#allocation10_spill]] }
 0x2e8   : > { %s5150_s27 = sld [smem:[#allocation11_spill]]  ;;  %s5151_s21 = smov %s3977_s22 }
 0x2e9   : > { %s5152_s22 = smov %s3981_s23  ;;  %s5153_s23 = smov %s4110_s13 }
 0x2ea   : > { %s5154_s24 = smov %s3993_s26  ;;  %22 = sbr.rel (!%p20_p0) target bundleno = 7 (0x7), region = 110 }
 0x2ed   : > { %s5155_s26 = smov %s5149_s9 }
 0x2f1   :  { %2978 = vsyncpa [#allocation4], 1 }
 0x2f2   :  { %2980 = vsyncpa [#allocation4 + $0x1], 1 }
 0x2f3   :  { %2981 = vsyncpa [#allocation6], 1 }
 0x2f4   :  { %2983 = vsyncpa [#allocation6 + $0x1], 1 }

</bundles_post_ra>
